<compile_context>
chip_gen: v5e
topology: v5e:2x2
jax: 0.10.0
libtpu: 0.0.40
codegen_flags: <defaults>
</compile_context>

<pallas_src>
import functools

import jax
import jax.numpy as jnp
from jax.experimental import pallas as pl
from jax.experimental.pallas import tpu as pltpu


# ------------------------------ fused kernel --------------------------------

def _sc_bottleneck_kernel(D, H, W, P,
                          x_ref, w1_ref, b1_ref, w2_ref, b2_ref,
                          w3_ref, b3_ref, m2_ref, m3_ref,
                          o_ref,
                          pbuf, im2_ref, im3_ref):
    """One batch element per grid step; everything stays in VMEM.

    x_ref  : (1, Cin, M)      channels-first input, M = D*H*W on lanes
    w1_ref : (C1, Cin)        stage-1 weights (BN scale folded in)
    b1_ref : (C1, 1)          stage-1 bias (conv bias + BN folded)
    w2_ref : (C1, 9*C1)       stage-2 im2col weights, col = (kd*3+kh)*C1 + ci
    b2_ref : (C1, 1)
    w3_ref : (C2, 3*C1)       stage-3 im2col weights, col = kw*C1 + ci
    b3_ref : (C2, 1)
    m2_ref : (9, M)           {0,1} validity mask per (kd,kh) tap
    m3_ref : (3, M)           {0,1} validity mask per kw tap
    o_ref  : (1, C2, M)
    pbuf   : (C1, P+M+P)      zero-haloed staging buffer for shifted taps
    im2_ref: (9*C1, M)        stage-2 im2col matrix
    im3_ref: (3*C1, M)        stage-3 im2col matrix
    """
    f32 = jnp.float32
    C1, _ = w1_ref.shape
    C2 = w3_ref.shape[0]
    M = D * H * W

    # Halos only ever need to be zero (out-of-range taps are also masked);
    # re-zero unconditionally each step: cheap, and safe under megacore grid
    # partitioning where each core has its own scratch.
    pbuf[:, 0:P] = jnp.zeros((C1, P), f32)
    pbuf[:, P + M:P + M + P] = jnp.zeros((C1, P), f32)

    # ---- stage 1: 1x1x1 conv + folded BN + ReLU -----------------------------
    # (C1, Cin) @ (Cin, M) -> (C1, M), lane-dense along M.
    x = x_ref[0]
    h1 = jnp.dot(w1_ref[...], x, preferred_element_type=f32) + b1_ref[...]
    h1 = jnp.maximum(h1, 0.0)

    # ---- stage 2: (3,3,1) conv + BN + ReLU as ONE K=9*C1 im2col matmul ------
    pbuf[:, P:P + M] = h1
    for kd in range(3):
        for kh in range(3):
            t = kd * 3 + kh
            s = (kd - 1) * H * W + (kh - 1) * W           # flat source offset
            tap = pbuf[:, P + s:P + s + M]                # shifted h1
            im2_ref[t * C1:(t + 1) * C1, :] = tap * m2_ref[t:t + 1, :]
    h2 = jnp.dot(w2_ref[...], im2_ref[...], preferred_element_type=f32)
    h2 = jnp.maximum(h2 + b2_ref[...], 0.0)               # (C1, M)

    # ---- stage 3: (1,1,3) conv + BN + ReLU as ONE K=3*C1 im2col matmul ------
    pbuf[:, P:P + M] = h2
    for kw in range(3):
        s = kw - 1
        tap = pbuf[:, P + s:P + s + M]
        im3_ref[kw * C1:(kw + 1) * C1, :] = tap * m3_ref[kw:kw + 1, :]
    h3 = jnp.dot(w3_ref[...], im3_ref[...], preferred_element_type=f32)
    o_ref[0] = jnp.maximum(h3 + b3_ref[...], 0.0)         # (C2, M)


# --------------------------------- wrapper -----------------------------------

@jax.jit
def sc_bottleneck_forward(x, kp):
    """x: (N, Cin, D, H, W) float32 -> (N, growth_rate, D, H, W) float32."""
    N, Cin, D, H, W = x.shape
    M = D * H * W
    C1 = kp["w1"].shape[0]
    C2 = kp["w3"].shape[0]
    # halo >= largest flat tap shift (H*W + W), rounded to a lane-tile multiple
    P = max(128, -(-(H * W + W) // 128) * 128)

    x_f = x.reshape(N, Cin, M)      # free reshape, no transpose

    kernel = functools.partial(_sc_bottleneck_kernel, D, H, W, P)
    out = pl.pallas_call(
        kernel,
        out_shape=jax.ShapeDtypeStruct((N, C2, M), jnp.float32),
        grid_spec=pltpu.PrefetchScalarGridSpec(
            num_scalar_prefetch=0,
            grid=(N,),
            in_specs=[
                pl.BlockSpec((1, Cin, M), lambda n: (n, 0, 0)),
                pl.BlockSpec((C1, Cin), lambda n: (0, 0)),
                pl.BlockSpec((C1, 1), lambda n: (0, 0)),
                pl.BlockSpec((C1, 9 * C1), lambda n: (0, 0)),
                pl.BlockSpec((C1, 1), lambda n: (0, 0)),
                pl.BlockSpec((C2, 3 * C1), lambda n: (0, 0)),
                pl.BlockSpec((C2, 1), lambda n: (0, 0)),
                pl.BlockSpec((9, M), lambda n: (0, 0)),
                pl.BlockSpec((3, M), lambda n: (0, 0)),
            ],
            out_specs=pl.BlockSpec((1, C2, M), lambda n: (n, 0, 0)),
            scratch_shapes=[
                pltpu.VMEM((C1, P + M + P), jnp.float32),   # staging buffer
                pltpu.VMEM((9 * C1, M), jnp.float32),       # stage-2 im2col
                pltpu.VMEM((3 * C1, M), jnp.float32),       # stage-3 im2col
            ]),
        compiler_params=pltpu.CompilerParams(
            dimension_semantics=("parallel",)),
    )(x_f, kp["w1"], kp["b1"], kp["w2"], kp["b2"], kp["w3"], kp["b3"],
      kp["m2"], kp["m3"])

    return out.reshape(N, C2, D, H, W)


# --------------------------- parameter creation -------------------------------

def make_params(in_channels, growth_rate, key):
    inter = 4 * growth_rate
    ks = jax.random.split(key, 16)

    def u(k, shape, lo=-0.5, hi=0.5):
        return jax.random.uniform(k, shape, jnp.float32, lo, hi)

    p = {}
    # conv weights / biases (PyTorch OIDHW convention)
    p["w_reduce"] = u(ks[0], (inter, in_channels, 1, 1, 1))
    p["b_reduce"] = u(ks[1], (inter,))
    p["w_dw"] = u(ks[2], (inter, inter, 3, 3, 1)) * 0.2
    p["b_dw"] = u(ks[3], (inter,))
    p["w_pw"] = u(ks[4], (growth_rate, inter, 1, 1, 3)) * 0.2
    p["b_pw"] = u(ks[5], (growth_rate,))
    # BatchNorm (eval-mode) params: gamma, beta, running_mean, running_var
    p["bn1"] = (u(ks[6], (inter,), 0.5, 1.5), u(ks[7], (inter,)),
                u(ks[8], (inter,)), u(ks[9], (inter,), 0.5, 1.5))
    p["bn2"] = (u(ks[10], (inter,), 0.5, 1.5), u(ks[11], (inter,)),
                u(ks[12], (inter,)), u(ks[13], (inter,), 0.5, 1.5))
    p["bn3"] = (u(ks[14], (growth_rate,), 0.5, 1.5), u(ks[15], (growth_rate,)),
                jnp.zeros((growth_rate,), jnp.float32),
                jnp.ones((growth_rate,), jnp.float32))
    return p


def _bn_fold(gamma, beta, mean, var, eps=1e-5):
    scale = gamma / jnp.sqrt(var + eps)
    return scale, beta - scale * mean


def to_kernel_params(p, spatial):
    """Fold BN into weights/biases, build im2col weights + boundary masks."""
    D, H, W = spatial
    M = D * H * W
    C1 = p["w_reduce"].shape[0]
    C2 = p["w_pw"].shape[0]

    s1, t1 = _bn_fold(*p["bn1"])
    s2, t2 = _bn_fold(*p["bn2"])
    s3, t3 = _bn_fold(*p["bn3"])

    kp = {}
    # stage 1: (C1, Cin)
    w1 = p["w_reduce"][:, :, 0, 0, 0]
    kp["w1"] = (s1[:, None] * w1).astype(jnp.float32)
    kp["b1"] = (s1 * p["b_reduce"] + t1)[:, None].astype(jnp.float32)

    # stage 2: (C1, 9*C1), column index = (kd*3 + kh)*C1 + ci
    w2 = jnp.transpose(p["w_dw"][:, :, :, :, 0], (0, 2, 3, 1))   # (Co,kd,kh,Ci)
    kp["w2"] = (s2[:, None] * w2.reshape(C1, 9 * C1)).astype(jnp.float32)
    kp["b2"] = (s2 * p["b_dw"] + t2)[:, None].astype(jnp.float32)

    # stage 3: (C2, 3*C1), column index = kw*C1 + ci
    w3 = jnp.transpose(p["w_pw"][:, :, 0, 0, :], (0, 2, 1))      # (Co,kw,Ci)
    kp["w3"] = (s3[:, None] * w3.reshape(C2, 3 * C1)).astype(jnp.float32)
    kp["b3"] = (s3 * p["b_pw"] + t3)[:, None].astype(jnp.float32)

    # {0,1} boundary masks for the flat (lane-dim) tap shifts
    m = jnp.arange(M)
    d_idx, h_idx, w_idx = m // (H * W), (m // W) % H, m % W
    m2 = []
    for kd in range(3):
        for kh in range(3):
            dd, dh = kd - 1, kh - 1
            m2.append((d_idx + dd >= 0) & (d_idx + dd < D) &
                      (h_idx + dh >= 0) & (h_idx + dh < H))
    kp["m2"] = jnp.stack(m2, 0).astype(jnp.float32)              # (9, M)
    m3 = [((w_idx + kw - 1 >= 0) & (w_idx + kw - 1 < W)) for kw in range(3)]
    kp["m3"] = jnp.stack(m3, 0).astype(jnp.float32)              # (3, M)
    return kp


# ------------------------------ pure-JAX reference ----------------------------

def reference_forward(x, p, eps=1e-5):
    def conv(y, w, b, pad):
        o = jax.lax.conv_general_dilated(
            y, w, (1, 1, 1), pad,
            dimension_numbers=("NCDHW", "OIDHW", "NCDHW"))
        return o + b.reshape(1, -1, 1, 1, 1)

    def bn_relu(y, gamma, beta, mean, var):
        r = lambda a: a.reshape(1, -1, 1, 1, 1)
        o = r(gamma) * (y - r(mean)) / jnp.sqrt(r(var) + eps) + r(beta)
        return jnp.maximum(o, 0.0)

    y = bn_relu(conv(x, p["w_reduce"], p["b_reduce"], [(0, 0)] * 3), *p["bn1"])
    y = bn_relu(conv(y, p["w_dw"], p["b_dw"], [(1, 1), (1, 1), (0, 0)]), *p["bn2"])
    y = bn_relu(conv(y, p["w_pw"], p["b_pw"], [(0, 0), (0, 0), (1, 1)]), *p["bn3"])
    return y


# ----------------------------------- main -------------------------------------

if __name__ == "__main__":
    key = jax.random.PRNGKey(0)
    kx, kparam = jax.random.split(key)

    N, Cin, D, H, W = 2, 4, 8, 8, 8
    growth_rate = 4

    x = jax.random.normal(kx, (N, Cin, D, H, W), jnp.float32)
    params = make_params(Cin, growth_rate, kparam)
    kparams = to_kernel_params(params, (D, H, W))

    out = jax.block_until_ready(sc_bottleneck_forward(x, kparams))
    ref = jax.block_until_ready(reference_forward(x, params))

    assert out.shape == (N, growth_rate, D, H, W), out.shape
    err = float(jnp.max(jnp.abs(out - ref)))
    assert jnp.allclose(out, ref, rtol=1e-4, atol=1e-4), err
    print("KERNEL_OK")
</pallas_src>

<mosaic_0001>
module attributes {stable_mosaic.version = 11 : i64} {
  func.func @_sc_bottleneck_kernel(%arg0: i32, %arg1: memref<1x4x512xf32, #tpu.memory_space<vmem>>, %arg2: memref<16x4xf32, #tpu.memory_space<vmem>>, %arg3: memref<16x1xf32, #tpu.memory_space<vmem>>, %arg4: memref<16x144xf32, #tpu.memory_space<vmem>>, %arg5: memref<16x1xf32, #tpu.memory_space<vmem>>, %arg6: memref<4x48xf32, #tpu.memory_space<vmem>>, %arg7: memref<4x1xf32, #tpu.memory_space<vmem>>, %arg8: memref<9x512xf32, #tpu.memory_space<vmem>>, %arg9: memref<3x512xf32, #tpu.memory_space<vmem>>, %arg10: memref<1x4x512xf32, #tpu.memory_space<vmem>>, %arg11: memref<16x768xf32, #tpu.memory_space<vmem>>, %arg12: memref<144x512xf32, #tpu.memory_space<vmem>>, %arg13: memref<48x512xf32, #tpu.memory_space<vmem>>) attributes {dimension_semantics = [#tpu.dimension_semantics<parallel>], iteration_bounds = array<i64: 2>, scalar_prefetch = 0 : i64, scratch_operands = 3 : i64, tpu.core_type = #tpu.core_type<tc>, window_params = [{transform_indices = @transform_0, window_bounds = array<i64: 1, 4, 512>}, {pipeline_mode = #tpu.pipeline_mode<synchronous>, transform_indices = @transform_1, window_bounds = array<i64: 16, 4>}, {pipeline_mode = #tpu.pipeline_mode<synchronous>, transform_indices = @transform_2, window_bounds = array<i64: 16, 1>}, {pipeline_mode = #tpu.pipeline_mode<synchronous>, transform_indices = @transform_3, window_bounds = array<i64: 16, 144>}, {pipeline_mode = #tpu.pipeline_mode<synchronous>, transform_indices = @transform_4, window_bounds = array<i64: 16, 1>}, {pipeline_mode = #tpu.pipeline_mode<synchronous>, transform_indices = @transform_5, window_bounds = array<i64: 4, 48>}, {pipeline_mode = #tpu.pipeline_mode<synchronous>, transform_indices = @transform_6, window_bounds = array<i64: 4, 1>}, {pipeline_mode = #tpu.pipeline_mode<synchronous>, transform_indices = @transform_7, window_bounds = array<i64: 9, 512>}, {pipeline_mode = #tpu.pipeline_mode<synchronous>, transform_indices = @transform_8, window_bounds = array<i64: 3, 512>}, {transform_indices = @transform_9, window_bounds = array<i64: 1, 4, 512>}]} {
    %cst = arith.constant 0.000000e+00 : f32
    %0 = vector.broadcast %cst : f32 to vector<16x128xf32>
    %c0 = arith.constant 0 : index
    %c0_0 = arith.constant 0 : index
    %1 = vector.load %arg11[%c0, %c0_0] : memref<16x768xf32, #tpu.memory_space<vmem>>, vector<16x128xf32>
    tpu.vector_store %arg11[%c0, %c0_0], %0 {strides = array<i32>} : memref<16x768xf32, #tpu.memory_space<vmem>>, vector<16x128xf32>,
    %cst_1 = arith.constant 0.000000e+00 : f32
    %2 = vector.broadcast %cst_1 : f32 to vector<16x128xf32>
    %c0_2 = arith.constant 0 : index
    %c640 = arith.constant 640 : index
    %3 = vector.load %arg11[%c0_2, %c640] : memref<16x768xf32, #tpu.memory_space<vmem>>, vector<16x128xf32>
    tpu.vector_store %arg11[%c0_2, %c640], %2 {strides = array<i32>} : memref<16x768xf32, #tpu.memory_space<vmem>>, vector<16x128xf32>,
    %c0_3 = arith.constant 0 : index
    %c0_4 = arith.constant 0 : index
    %c0_5 = arith.constant 0 : index
    %4 = vector.load %arg1[%c0_3, %c0_4, %c0_5] : memref<1x4x512xf32, #tpu.memory_space<vmem>>, vector<1x4x512xf32>
    %5 = vector.shape_cast %4 : vector<1x4x512xf32> to vector<4x512xf32>
    %c0_6 = arith.constant 0 : index
    %c0_7 = arith.constant 0 : index
    %6 = vector.load %arg2[%c0_6, %c0_7] : memref<16x4xf32, #tpu.memory_space<vmem>>, vector<16x4xf32>
    %cst_8 = arith.constant dense<0.000000e+00> : vector<16x512xf32>
    %7 = tpu.matmul %6, %5, %cst_8 {dimension_numbers = #tpu.dot_dimension_numbers<[1], [0], [0], [1], [0, 0, 1, 1], [], []>} : vector<16x4xf32>, vector<4x512xf32>, vector<16x512xf32> -> vector<16x512xf32>
    %c0_9 = arith.constant 0 : index
    %c0_10 = arith.constant 0 : index
    %8 = vector.load %arg3[%c0_9, %c0_10] : memref<16x1xf32, #tpu.memory_space<vmem>>, vector<16x1xf32>
    %9 = vector.broadcast %8 : vector<16x1xf32> to vector<16x512xf32>
    %10 = arith.addf %7, %9 : vector<16x512xf32>
    %cst_11 = arith.constant 0.000000e+00 : f32
    %11 = vector.broadcast %cst_11 : f32 to vector<16x512xf32>
    %12 = arith.maximumf %10, %11 : vector<16x512xf32>
    %c0_12 = arith.constant 0 : index
    %c128 = arith.constant 128 : index
    %13 = vector.load %arg11[%c0_12, %c128] : memref<16x768xf32, #tpu.memory_space<vmem>>, vector<16x512xf32>
    tpu.vector_store %arg11[%c0_12, %c128], %12 {strides = array<i32>} : memref<16x768xf32, #tpu.memory_space<vmem>>, vector<16x512xf32>,
    %c0_13 = arith.constant 0 : index
    %c56 = arith.constant 56 : index
    %14 = vector.load %arg11[%c0_13, %c56] : memref<16x768xf32, #tpu.memory_space<vmem>>, vector<16x512xf32>
    %c0_14 = arith.constant 0 : index
    %c0_15 = arith.constant 0 : index
    %15 = vector.load %arg8[%c0_14, %c0_15] : memref<9x512xf32, #tpu.memory_space<vmem>>, vector<1x512xf32>
    %16 = vector.broadcast %15 : vector<1x512xf32> to vector<16x512xf32>
    %17 = arith.mulf %14, %16 : vector<16x512xf32>
    %c0_16 = arith.constant 0 : index
    %c0_17 = arith.constant 0 : index
    %18 = vector.load %arg12[%c0_16, %c0_17] : memref<144x512xf32, #tpu.memory_space<vmem>>, vector<16x512xf32>
    tpu.vector_store %arg12[%c0_16, %c0_17], %17 {strides = array<i32>} : memref<144x512xf32, #tpu.memory_space<vmem>>, vector<16x512xf32>,
    %c0_18 = arith.constant 0 : index
    %c64 = arith.constant 64 : index
    %19 = vector.load %arg11[%c0_18, %c64] : memref<16x768xf32, #tpu.memory_space<vmem>>, vector<16x512xf32>
    %c1 = arith.constant 1 : index
    %c0_19 = arith.constant 0 : index
    %20 = vector.load %arg8[%c1, %c0_19] : memref<9x512xf32, #tpu.memory_space<vmem>>, vector<1x512xf32>
    %21 = vector.broadcast %20 : vector<1x512xf32> to vector<16x512xf32>
    %22 = arith.mulf %19, %21 : vector<16x512xf32>
    %c16 = arith.constant 16 : index
    %c0_20 = arith.constant 0 : index
    %23 = vector.load %arg12[%c16, %c0_20] : memref<144x512xf32, #tpu.memory_space<vmem>>, vector<16x512xf32>
    tpu.vector_store %arg12[%c16, %c0_20], %22 {strides = array<i32>} : memref<144x512xf32, #tpu.memory_space<vmem>>, vector<16x512xf32>,
    %c0_21 = arith.constant 0 : index
    %c72 = arith.constant 72 : index
    %24 = vector.load %arg11[%c0_21, %c72] : memref<16x768xf32, #tpu.memory_space<vmem>>, vector<16x512xf32>
    %c2 = arith.constant 2 : index
    %c0_22 = arith.constant 0 : index
    %25 = vector.load %arg8[%c2, %c0_22] : memref<9x512xf32, #tpu.memory_space<vmem>>, vector<1x512xf32>
    %26 = vector.broadcast %25 : vector<1x512xf32> to vector<16x512xf32>
    %27 = arith.mulf %24, %26 : vector<16x512xf32>
    %c32 = arith.constant 32 : index
    %c0_23 = arith.constant 0 : index
    %28 = vector.load %arg12[%c32, %c0_23] : memref<144x512xf32, #tpu.memory_space<vmem>>, vector<16x512xf32>
    tpu.vector_store %arg12[%c32, %c0_23], %27 {strides = array<i32>} : memref<144x512xf32, #tpu.memory_space<vmem>>, vector<16x512xf32>,
    %c0_24 = arith.constant 0 : index
    %c120 = arith.constant 120 : index
    %29 = vector.load %arg11[%c0_24, %c120] : memref<16x768xf32, #tpu.memory_space<vmem>>, vector<16x512xf32>
    %c3 = arith.constant 3 : index
    %c0_25 = arith.constant 0 : index
    %30 = vector.load %arg8[%c3, %c0_25] : memref<9x512xf32, #tpu.memory_space<vmem>>, vector<1x512xf32>
    %31 = vector.broadcast %30 : vector<1x512xf32> to vector<16x512xf32>
    %32 = arith.mulf %29, %31 : vector<16x512xf32>
    %c48 = arith.constant 48 : index
    %c0_26 = arith.constant 0 : index
    %33 = vector.load %arg12[%c48, %c0_26] : memref<144x512xf32, #tpu.memory_space<vmem>>, vector<16x512xf32>
    tpu.vector_store %arg12[%c48, %c0_26], %32 {strides = array<i32>} : memref<144x512xf32, #tpu.memory_space<vmem>>, vector<16x512xf32>,
    %c0_27 = arith.constant 0 : index
    %c128_28 = arith.constant 128 : index
    %34 = vector.load %arg11[%c0_27, %c128_28] : memref<16x768xf32, #tpu.memory_space<vmem>>, vector<16x512xf32>
    %c4 = arith.constant 4 : index
    %c0_29 = arith.constant 0 : index
    %35 = vector.load %arg8[%c4, %c0_29] : memref<9x512xf32, #tpu.memory_space<vmem>>, vector<1x512xf32>
    %36 = vector.broadcast %35 : vector<1x512xf32> to vector<16x512xf32>
    %37 = arith.mulf %34, %36 : vector<16x512xf32>
    %c64_30 = arith.constant 64 : index
    %c0_31 = arith.constant 0 : index
    %38 = vector.load %arg12[%c64_30, %c0_31] : memref<144x512xf32, #tpu.memory_space<vmem>>, vector<16x512xf32>
    tpu.vector_store %arg12[%c64_30, %c0_31], %37 {strides = array<i32>} : memref<144x512xf32, #tpu.memory_space<vmem>>, vector<16x512xf32>,
    %c0_32 = arith.constant 0 : index
    %c136 = arith.constant 136 : index
    %39 = vector.load %arg11[%c0_32, %c136] : memref<16x768xf32, #tpu.memory_space<vmem>>, vector<16x512xf32>
    %c5 = arith.constant 5 : index
    %c0_33 = arith.constant 0 : index
    %40 = vector.load %arg8[%c5, %c0_33] : memref<9x512xf32, #tpu.memory_space<vmem>>, vector<1x512xf32>
    %41 = vector.broadcast %40 : vector<1x512xf32> to vector<16x512xf32>
    %42 = arith.mulf %39, %41 : vector<16x512xf32>
    %c80 = arith.constant 80 : index
    %c0_34 = arith.constant 0 : index
    %43 = vector.load %arg12[%c80, %c0_34] : memref<144x512xf32, #tpu.memory_space<vmem>>, vector<16x512xf32>
    tpu.vector_store %arg12[%c80, %c0_34], %42 {strides = array<i32>} : memref<144x512xf32, #tpu.memory_space<vmem>>, vector<16x512xf32>,
    %c0_35 = arith.constant 0 : index
    %c184 = arith.constant 184 : index
    %44 = vector.load %arg11[%c0_35, %c184] : memref<16x768xf32, #tpu.memory_space<vmem>>, vector<16x512xf32>
    %c6 = arith.constant 6 : index
    %c0_36 = arith.constant 0 : index
    %45 = vector.load %arg8[%c6, %c0_36] : memref<9x512xf32, #tpu.memory_space<vmem>>, vector<1x512xf32>
    %46 = vector.broadcast %45 : vector<1x512xf32> to vector<16x512xf32>
    %47 = arith.mulf %44, %46 : vector<16x512xf32>
    %c96 = arith.constant 96 : index
    %c0_37 = arith.constant 0 : index
    %48 = vector.load %arg12[%c96, %c0_37] : memref<144x512xf32, #tpu.memory_space<vmem>>, vector<16x512xf32>
    tpu.vector_store %arg12[%c96, %c0_37], %47 {strides = array<i32>} : memref<144x512xf32, #tpu.memory_space<vmem>>, vector<16x512xf32>,
    %c0_38 = arith.constant 0 : index
    %c192 = arith.constant 192 : index
    %49 = vector.load %arg11[%c0_38, %c192] : memref<16x768xf32, #tpu.memory_space<vmem>>, vector<16x512xf32>
    %c7 = arith.constant 7 : index
    %c0_39 = arith.constant 0 : index
    %50 = vector.load %arg8[%c7, %c0_39] : memref<9x512xf32, #tpu.memory_space<vmem>>, vector<1x512xf32>
    %51 = vector.broadcast %50 : vector<1x512xf32> to vector<16x512xf32>
    %52 = arith.mulf %49, %51 : vector<16x512xf32>
    %c112 = arith.constant 112 : index
    %c0_40 = arith.constant 0 : index
    %53 = vector.load %arg12[%c112, %c0_40] : memref<144x512xf32, #tpu.memory_space<vmem>>, vector<16x512xf32>
    tpu.vector_store %arg12[%c112, %c0_40], %52 {strides = array<i32>} : memref<144x512xf32, #tpu.memory_space<vmem>>, vector<16x512xf32>,
    %c0_41 = arith.constant 0 : index
    %c200 = arith.constant 200 : index
    %54 = vector.load %arg11[%c0_41, %c200] : memref<16x768xf32, #tpu.memory_space<vmem>>, vector<16x512xf32>
    %c8 = arith.constant 8 : index
    %c0_42 = arith.constant 0 : index
    %55 = vector.load %arg8[%c8, %c0_42] : memref<9x512xf32, #tpu.memory_space<vmem>>, vector<1x512xf32>
    %56 = vector.broadcast %55 : vector<1x512xf32> to vector<16x512xf32>
    %57 = arith.mulf %54, %56 : vector<16x512xf32>
    %c128_43 = arith.constant 128 : index
    %c0_44 = arith.constant 0 : index
    %58 = vector.load %arg12[%c128_43, %c0_44] : memref<144x512xf32, #tpu.memory_space<vmem>>, vector<16x512xf32>
    tpu.vector_store %arg12[%c128_43, %c0_44], %57 {strides = array<i32>} : memref<144x512xf32, #tpu.memory_space<vmem>>, vector<16x512xf32>,
    %c0_45 = arith.constant 0 : index
    %c0_46 = arith.constant 0 : index
    %59 = vector.load %arg4[%c0_45, %c0_46] : memref<16x144xf32, #tpu.memory_space<vmem>>, vector<16x144xf32>
    %c0_47 = arith.constant 0 : index
    %c0_48 = arith.constant 0 : index
    %60 = vector.load %arg12[%c0_47, %c0_48] : memref<144x512xf32, #tpu.memory_space<vmem>>, vector<144x512xf32>
    %cst_49 = arith.constant dense<0.000000e+00> : vector<16x512xf32>
    %61 = tpu.matmul %59, %60, %cst_49 {dimension_numbers = #tpu.dot_dimension_numbers<[1], [0], [0], [1], [0, 0, 1, 1], [], []>} : vector<16x144xf32>, vector<144x512xf32>, vector<16x512xf32> -> vector<16x512xf32>
    %c0_50 = arith.constant 0 : index
    %c0_51 = arith.constant 0 : index
    %62 = vector.load %arg5[%c0_50, %c0_51] : memref<16x1xf32, #tpu.memory_space<vmem>>, vector<16x1xf32>
    %63 = vector.broadcast %62 : vector<16x1xf32> to vector<16x512xf32>
    %64 = arith.addf %61, %63 : vector<16x512xf32>
    %cst_52 = arith.constant 0.000000e+00 : f32
    %65 = vector.broadcast %cst_52 : f32 to vector<16x512xf32>
    %66 = arith.maximumf %64, %65 : vector<16x512xf32>
    %c0_53 = arith.constant 0 : index
    %c128_54 = arith.constant 128 : index
    %67 = vector.load %arg11[%c0_53, %c128_54] : memref<16x768xf32, #tpu.memory_space<vmem>>, vector<16x512xf32>
    tpu.vector_store %arg11[%c0_53, %c128_54], %66 {strides = array<i32>} : memref<16x768xf32, #tpu.memory_space<vmem>>, vector<16x512xf32>,
    %c0_55 = arith.constant 0 : index
    %c127 = arith.constant 127 : index
    %68 = vector.load %arg11[%c0_55, %c127] : memref<16x768xf32, #tpu.memory_space<vmem>>, vector<16x512xf32>
    %c0_56 = arith.constant 0 : index
    %c0_57 = arith.constant 0 : index
    %69 = vector.load %arg9[%c0_56, %c0_57] : memref<3x512xf32, #tpu.memory_space<vmem>>, vector<1x512xf32>
    %70 = vector.broadcast %69 : vector<1x512xf32> to vector<16x512xf32>
    %71 = arith.mulf %68, %70 : vector<16x512xf32>
    %c0_58 = arith.constant 0 : index
    %c0_59 = arith.constant 0 : index
    %72 = vector.load %arg13[%c0_58, %c0_59] : memref<48x512xf32, #tpu.memory_space<vmem>>, vector<16x512xf32>
    tpu.vector_store %arg13[%c0_58, %c0_59], %71 {strides = array<i32>} : memref<48x512xf32, #tpu.memory_space<vmem>>, vector<16x512xf32>,
    %c0_60 = arith.constant 0 : index
    %c128_61 = arith.constant 128 : index
    %73 = vector.load %arg11[%c0_60, %c128_61] : memref<16x768xf32, #tpu.memory_space<vmem>>, vector<16x512xf32>
    %c1_62 = arith.constant 1 : index
    %c0_63 = arith.constant 0 : index
    %74 = vector.load %arg9[%c1_62, %c0_63] : memref<3x512xf32, #tpu.memory_space<vmem>>, vector<1x512xf32>
    %75 = vector.broadcast %74 : vector<1x512xf32> to vector<16x512xf32>
    %76 = arith.mulf %73, %75 : vector<16x512xf32>
    %c16_64 = arith.constant 16 : index
    %c0_65 = arith.constant 0 : index
    %77 = vector.load %arg13[%c16_64, %c0_65] : memref<48x512xf32, #tpu.memory_space<vmem>>, vector<16x512xf32>
    tpu.vector_store %arg13[%c16_64, %c0_65], %76 {strides = array<i32>} : memref<48x512xf32, #tpu.memory_space<vmem>>, vector<16x512xf32>,
    %c0_66 = arith.constant 0 : index
    %c129 = arith.constant 129 : index
    %78 = vector.load %arg11[%c0_66, %c129] : memref<16x768xf32, #tpu.memory_space<vmem>>, vector<16x512xf32>
    %c2_67 = arith.constant 2 : index
    %c0_68 = arith.constant 0 : index
    %79 = vector.load %arg9[%c2_67, %c0_68] : memref<3x512xf32, #tpu.memory_space<vmem>>, vector<1x512xf32>
    %80 = vector.broadcast %79 : vector<1x512xf32> to vector<16x512xf32>
    %81 = arith.mulf %78, %80 : vector<16x512xf32>
    %c32_69 = arith.constant 32 : index
    %c0_70 = arith.constant 0 : index
    %82 = vector.load %arg13[%c32_69, %c0_70] : memref<48x512xf32, #tpu.memory_space<vmem>>, vector<16x512xf32>
    tpu.vector_store %arg13[%c32_69, %c0_70], %81 {strides = array<i32>} : memref<48x512xf32, #tpu.memory_space<vmem>>, vector<16x512xf32>,
    %c0_71 = arith.constant 0 : index
    %c0_72 = arith.constant 0 : index
    %83 = vector.load %arg6[%c0_71, %c0_72] : memref<4x48xf32, #tpu.memory_space<vmem>>, vector<4x48xf32>
    %c0_73 = arith.constant 0 : index
    %c0_74 = arith.constant 0 : index
    %84 = vector.load %arg13[%c0_73, %c0_74] : memref<48x512xf32, #tpu.memory_space<vmem>>, vector<48x512xf32>
    %cst_75 = arith.constant dense<0.000000e+00> : vector<4x512xf32>
    %85 = tpu.matmul %83, %84, %cst_75 {dimension_numbers = #tpu.dot_dimension_numbers<[1], [0], [0], [1], [0, 0, 1, 1], [], []>} : vector<4x48xf32>, vector<48x512xf32>, vector<4x512xf32> -> vector<4x512xf32>
    %c0_76 = arith.constant 0 : index
    %c0_77 = arith.constant 0 : index
    %86 = vector.load %arg7[%c0_76, %c0_77] : memref<4x1xf32, #tpu.memory_space<vmem>>, vector<4x1xf32>
    %87 = vector.broadcast %86 : vector<4x1xf32> to vector<4x512xf32>
    %88 = arith.addf %85, %87 : vector<4x512xf32>
    %cst_78 = arith.constant 0.000000e+00 : f32
    %89 = vector.broadcast %cst_78 : f32 to vector<4x512xf32>
    %90 = arith.maximumf %88, %89 : vector<4x512xf32>
    %c0_79 = arith.constant 0 : index
    %c0_80 = arith.constant 0 : index
    %c0_81 = arith.constant 0 : index
    %91 = vector.load %arg10[%c0_79, %c0_80, %c0_81] : memref<1x4x512xf32, #tpu.memory_space<vmem>>, vector<1x4x512xf32>
    %92 = vector.shape_cast %91 : vector<1x4x512xf32> to vector<4x512xf32>
    %93 = vector.shape_cast %90 : vector<4x512xf32> to vector<1x4x512xf32>
    tpu.vector_store %arg10[%c0_79, %c0_80, %c0_81], %93 {strides = array<i32>} : memref<1x4x512xf32, #tpu.memory_space<vmem>>, vector<1x4x512xf32>,
    return
  }
  func.func @transform_0(%arg0: i32) -> (i32, i32, i32) {
    %c0_i32 = arith.constant 0 : i32
    %c0_i32_0 = arith.constant 0 : i32
    %c0_i32_1 = arith.constant 0 : i32
    return %arg0, %c0_i32, %c0_i32_0 : i32, i32, i32
  }
  func.func @transform_1(%arg0: i32) -> (i32, i32) {
    %c0_i32 = arith.constant 0 : i32
    %c0_i32_0 = arith.constant 0 : i32
    %c0_i32_1 = arith.constant 0 : i32
    return %c0_i32, %c0_i32_0 : i32, i32
  }
  func.func @transform_2(%arg0: i32) -> (i32, i32) {
    %c0_i32 = arith.constant 0 : i32
    %c0_i32_0 = arith.constant 0 : i32
    %c0_i32_1 = arith.constant 0 : i32
    return %c0_i32, %c0_i32_0 : i32, i32
  }
  func.func @transform_3(%arg0: i32) -> (i32, i32) {
    %c0_i32 = arith.constant 0 : i32
    %c0_i32_0 = arith.constant 0 : i32
    %c0_i32_1 = arith.constant 0 : i32
    return %c0_i32, %c0_i32_0 : i32, i32
  }
  func.func @transform_4(%arg0: i32) -> (i32, i32) {
    %c0_i32 = arith.constant 0 : i32
    %c0_i32_0 = arith.constant 0 : i32
    %c0_i32_1 = arith.constant 0 : i32
    return %c0_i32, %c0_i32_0 : i32, i32
  }
  func.func @transform_5(%arg0: i32) -> (i32, i32) {
    %c0_i32 = arith.constant 0 : i32
    %c0_i32_0 = arith.constant 0 : i32
    %c0_i32_1 = arith.constant 0 : i32
    return %c0_i32, %c0_i32_0 : i32, i32
  }
  func.func @transform_6(%arg0: i32) -> (i32, i32) {
    %c0_i32 = arith.constant 0 : i32
    %c0_i32_0 = arith.constant 0 : i32
    %c0_i32_1 = arith.constant 0 : i32
    return %c0_i32, %c0_i32_0 : i32, i32
  }
  func.func @transform_7(%arg0: i32) -> (i32, i32) {
    %c0_i32 = arith.constant 0 : i32
    %c0_i32_0 = arith.constant 0 : i32
    %c0_i32_1 = arith.constant 0 : i32
    return %c0_i32, %c0_i32_0 : i32, i32
  }
  func.func @transform_8(%arg0: i32) -> (i32, i32) {
    %c0_i32 = arith.constant 0 : i32
    %c0_i32_0 = arith.constant 0 : i32
    %c0_i32_1 = arith.constant 0 : i32
    return %c0_i32, %c0_i32_0 : i32, i32
  }
  func.func @transform_9(%arg0: i32) -> (i32, i32, i32) {
    %c0_i32 = arith.constant 0 : i32
    %c0_i32_0 = arith.constant 0 : i32
    %c0_i32_1 = arith.constant 0 : i32
    return %arg0, %c0_i32, %c0_i32_0 : i32, i32, i32
  }
}

</mosaic_0001>

<bundles_post_ra>
// kernel: sc_bottleneck_forward.1
= control target key start
LH: loop header
LB: loop body
LE: loop exit
PB: predicated region body
PF: predicated region fallthrough
CT: control target
= control target key end

     0   :  { %s2394_s30 = smov 0   ;;  %s3336_s0 = inlined_call_operand.vmem [shape: f32[2,4,512], index: 0, kind: input, shape index: {}]   ;;  %s3337_s1 = inlined_call_operand.vmem [shape: f32[16,4], index: 1, kind: input, shape index: {}]   ;;  %s3338_s2 = inlined_call_operand.vmem [shape: f32[16,1], index: 2, kind: input, shape index: {}]   ;;  %s3339_s3 = inlined_call_operand.vmem [shape: f32[16,144], index: 3, kind: input, shape index: {}]   ;;  %s3340_s4 = inlined_call_operand.vmem [shape: f32[16,1], index: 4, kind: input, shape index: {}]   ;;  %s3341_s5 = inlined_call_operand.vmem [shape: f32[4,48], index: 5, kind: input, shape index: {}]   ;;  %s3342_s6 = inlined_call_operand.vmem [shape: f32[4,1], index: 6, kind: input, shape index: {}]   ;;  %s3343_s7 = inlined_call_operand.vmem [shape: f32[9,512], index: 7, kind: input, shape index: {}]   ;;  %s3344_s8 = inlined_call_operand.vmem [shape: f32[3,512], index: 8, kind: input, shape index: {}]   ;;  %s3345_s9 = inlined_call_operand.vmem [shape: f32[2,4,512], index: 9, kind: output, shape index: {}]  }
   0x1 LB: > { %s2012_s10 = sadd.s32 4294967295, %s2334_s30   ;;  %p2016_p0 = scmp.ge.s32.totalorder %s2334_s30, 1  ;;  %s2334_s30 = sphi %s2394_s30, %s19_s30  }
   0x2   : > { %p287_p1 = scmp.lt.s32.totalorder %s2334_s30, 3 }
   0x4   : > { %p288_p2 = pnand %p2016_p0, %p287_p1 }
   0x5   : > { %p323_p3 = scmp.lt.s32.totalorder (!%p288_p2), %s2012_s10, 1  ;;  %s2337_s15 = smov (!%p288_p2), 64  }
   0x6   : > { %291 = sbr.rel (%p288_p2) target bundleno = 825 (0x339), region = 56  ;;  %s2338_s24 = smov (!%p288_p2), 56  }
   0x7   : > { %s2339_s29 = smov (!%p288_p2), 8   ;;  %s2340_s16 = smov (!%p288_p2), 120  }
   0x8   : > { %s2341_s20 = smov (!%p288_p2), 72   ;;  %s2343_s22 = smov (!%p288_p2), 127  }
   0xb   : > { %v342_v0 = vld [vmem:[%s3338_s2 + $0x8] sm:$0xff]  ;;  %v2336_v2 = vmov 0   ;;  %s3354_s10 = smov (!%p323_p3, %s2012_s10), 1  ;;  %v341_v6 = vld [vmem:[%s3338_s2] sm:$0xff]  ;;  %vm369_vm0 = vcmask 1043456   ;;  %vm362_vm1 = vcmask 31744  }
   0xc   : > { %v2408_v1 = vld [vmem:[%s3343_s7 + $0x7] ss:$8 sm:$0xf]  ;;  %2075 = vset.pattern.permute.xlu0 %v2336_v2  ;;  %2276 = vset.pattern.permute.xlu2 %v2336_v2  ;;  %v2419_v5 = vld [vmem:[%s3343_s7 + $0x6] ss:$8 sm:$0xf] }
   0xd   : > { %v1122_v3 = vperm.slane %v2408_v1, 2  ;;  %v1120_v4 = vperm.slane %v2408_v1, 0  ;;  %350 = vperm.xlu0 %2075, %v342_v0   ;;  %2327 = vset.pattern.permute.xlu1 %v2336_v2  ;;  %s2057_s18 = sshll.u32 %s3354_s10, 4  ;;  %v1121_v7 = vperm.slane %v2408_v1, 1  ;;  %v1023_v8 = vperm.slane %v2419_v5, 0  ;;  %v339_v11 = vld [vmem:[%s3337_s1] sm:$0xff] }
   0xe   : > { %s327_s21 = scalar_lea.vmem %s3336_s0, %s2057_s18  ;;  %v1024_v12 = vperm.slane %v2419_v5, 1  ;;  %v1025_v13 = vperm.slane %v2419_v5, 2  ;;  %v2442_v14 = vld [vmem:[%s3343_s7 + $0x5] ss:$8 sm:$0xf]  ;;  %v1123_v31 = vperm.slane %v2408_v1, 3  ;;  %s332_s19 = scalar_lea.vmem %s3345_s9, %s2057_s18 }
   0xf   : > { %1128 = vrot.lane.b32.xlu2 %v1122_v3, %s2337_s15  ;;  %1124 = vrot.lane.b32.xlu1 %v1120_v4, %s2337_s15  ;;  %v337_v9 = vld [vmem:[%s327_s21] sm:$0xff]  ;;  %v338_v10 = vld [vmem:[%s327_s21 + $0x8] sm:$0xff]  ;;  %v926_v19 = vperm.slane %v2442_v14, 0  ;;  %v927_v22 = vperm.slane %v2442_v14, 1  ;;  %v928_v23 = vperm.slane %v2442_v14, 2  ;;  %v1026_v37 = vperm.slane %v2419_v5, 3 }
  0x10   : > { %355 = vst [vmem:[#allocation1] ss:$2 sm:$0xff] %v337_v9  ;;  %v2035_v20 = vld [vmem:[%s3343_s7 + $0x3] ss:$8 sm:$0xf]  ;;  %v929_v42 = vperm.slane %v2442_v14, 3 }
  0x11   : > { %357 = vst [vmem:[#allocation1 + $0x10] ss:$2 sm:$0xff] %v338_v10  ;;  %v340_v21 = vld [vmem:[%s3337_s1 + $0x8] sm:$0xff]  ;;  %v792_v24 = vperm.slane %v2035_v20, 0  ;;  %v793_v26 = vperm.slane %v2035_v20, 1  ;;  %v794_v27 = vperm.slane %v2035_v20, 2 }
  0x12   : > { %v2034_v25 = vld [vmem:[%s3343_s7 + $0x2] ss:$8 sm:$0xf]  ;;  %v2033_v32 = vld [vmem:[%s3343_s7 + $0x1] ss:$8 sm:$0xf] }
  0x13   : > { %v695_v28 = vperm.slane %v2034_v25, 0  ;;  %v696_v29 = vperm.slane %v2034_v25, 1  ;;  %v697_v30 = vperm.slane %v2034_v25, 2  ;;  %v597_v33 = vperm.slane %v2033_v32, 0 }
  0x14   : > { %v598_v34 = vperm.slane %v2033_v32, 1  ;;  %v599_v35 = vperm.slane %v2033_v32, 2  ;;  %v496_v36 = vld [vmem:[%s3343_s7] ss:$8 sm:$0xf]  ;;  %v795_v46 = vperm.slane %v2035_v20, 3 }
  0x15   : > { %345 = vperm.xlu0 %2075, %v341_v6   ;;  %v498_v38 = vperm.slane %v496_v36, 0  ;;  %v499_v39 = vperm.slane %v496_v36, 1  ;;  %v2040_v40 = vld [vmem:[%s3343_s7 + $0x20] ss:$8 sm:$0xf]  ;;  %v500_v41 = vperm.slane %v496_v36, 2 }
  0x16   : > { %v1217_v43 = vperm.slane %v2040_v40, 0  ;;  %v1218_v44 = vperm.slane %v2040_v40, 1  ;;  %v1219_v45 = vperm.slane %v2040_v40, 2  ;;  %v698_v47 = vperm.slane %v2034_v25, 3 }
  0x17   : > { %1126 = vrot.lane.b32.xlu1 %v1121_v7, %s2337_s15  ;;  %1027 = vrot.lane.b32.xlu2 %v1023_v8, %s2338_s24  ;;  %v358_v15 = vld.sshfl [vmem:[#allocation1] sm:$0xff pattern:$0x75316420]  ;;  %v359_v16 = vld.sshfl [vmem:[#allocation1 + $0x8] sm:$0xff pattern:$0x75316420] }
  0x18   : > { %2021 = vmatpush.msk.msra.mxu0 %vm369_vm0, %v358_v15  ;;  %2024 = vmatpush.msk.msra.mxu1 %vm369_vm0, %v359_v16  ;;  %v360_v17 = vld.sshfl [vmem:[#allocation1 + $0x10] sm:$0xff pattern:$0x75316420]  ;;  %v361_v18 = vld.sshfl [vmem:[#allocation1 + $0x18] sm:$0xff pattern:$0x75316420] }
  0x19   : > { %2027 = vmatpush.msk.msra.mxu2 %vm369_vm0, %v360_v17  ;;  %2030 = vmatpush.msk.msra.mxu3 %vm369_vm0, %v361_v18  ;;  %v1220_v48 = vperm.slane %v2040_v40, 3  ;;  %v600_v49 = vperm.slane %v2033_v32, 3  ;;  %v501_v50 = vperm.slane %v496_v36, 3  ;;  %vm609_vm2 = vcmask 523264  }
  0x1a   : > { %2022 = vmatmul.msk.f32.vlgmr.msra.gmra.mxu0 %vm362_vm1, %v339_v11  ;;  %2025 = vmatmul.msk.f32.vlgmr.msra.gmra.mxu1 %vm362_vm1, %v339_v11  ;;  %vm510_vm3 = vcmask 457728   ;;  %vm559_vm4 = vcmask 588800   ;;  %vm853_vm5 = vcmask 64512   ;;  %vm804_vm6 = vcmask 982016  }
  0x1b   : > { %2028 = vmatmul.msk.f32.vlgmr.msra.gmra.mxu2 %vm362_vm1, %v339_v11  ;;  %2031 = vmatmul.msk.f32.vlgmr.msra.gmra.mxu3 %vm362_vm1, %v339_v11  ;;  %vm1389_vm7 = vcmask 130048   ;;  %vm1669_vm8 = vcmask 7168   ;;  %vm1620_vm9 = vcmask 1039360   ;;  %vm1857_vm10 = vcmask 392192  }
  0x1d   : > { %1029 = vrot.lane.b32.xlu0 %v1024_v12, %s2338_s24 }
  0x1f   : > { %1031 = vrot.lane.b32.xlu1 %v1025_v13, %s2338_s24  ;;  %930 = vrot.lane.b32.xlu2 %v926_v19, %s2339_s29 }
  0x22   : > { %2023 = vmatmul.msk.f32.gmra.mxu0 %vm362_vm1, %v340_v21  ;;  %2026 = vmatmul.msk.f32.gmra.mxu1 %vm362_vm1, %v340_v21 }
  0x23   : > { %2029 = vmatmul.msk.f32.gmra.mxu2 %vm362_vm1, %v340_v21  ;;  %2032 = vmatmul.msk.f32.gmra.mxu3 %vm362_vm1, %v340_v21 }
  0x25   : > { %932 = vrot.lane.b32.xlu0 %v927_v22, %s2339_s29 }
  0x27   : > { %934 = vrot.lane.b32.xlu1 %v928_v23, %s2339_s29  ;;  %796 = vrot.lane.b32.xlu2 %v792_v24, %s2340_s16 }
  0x2d   : > { %798 = vrot.lane.b32.xlu0 %v793_v26, %s2340_s16 }
  0x2f   : > { %800 = vrot.lane.b32.xlu1 %v794_v27, %s2340_s16  ;;  %699 = vrot.lane.b32.xlu2 %v695_v28, %s2341_s20 }
  0x35   : > { %701 = vrot.lane.b32.xlu0 %v696_v29, %s2341_s20 }
  0x37   : > { %703 = vrot.lane.b32.xlu1 %v697_v30, %s2341_s20  ;;  %1130 = vrot.lane.b32.xlu2 %v1123_v31, %s2337_s15 }
  0x3d   : > { %601 = vrot.lane.b32.xlu0 %v597_v33, %s2337_s15 }
  0x3f   : > { %603 = vrot.lane.b32.xlu1 %v598_v34, %s2337_s15  ;;  %605 = vrot.lane.b32.xlu2 %v599_v35, %s2337_s15 }
  0x45   : > { %1033 = vrot.lane.b32.xlu0 %v1026_v37, %s2338_s24 }
  0x47   : > { %502 = vrot.lane.b32.xlu1 %v498_v38, %s2338_s24  ;;  %504 = vrot.lane.b32.xlu2 %v499_v39, %s2338_s24 }
  0x4d   : > { %506 = vrot.lane.b32.xlu0 %v500_v41, %s2338_s24 }
  0x4f   : > { %936 = vrot.lane.b32.xlu1 %v929_v42, %s2339_s29  ;;  %1221 = vrot.lane.b32.xlu2 %v1217_v43, %s2341_s20 }
  0x55   : > { %1223 = vrot.lane.b32.xlu0 %v1218_v44, %s2341_s20 }
  0x57   : > { %1225 = vrot.lane.b32.xlu1 %v1219_v45, %s2341_s20  ;;  %802 = vrot.lane.b32.xlu2 %v795_v46, %s2340_s16 }
  0x5d   : > { %705 = vrot.lane.b32.xlu0 %v698_v47, %s2341_s20 }
  0x5f   : > { %1227 = vrot.lane.b32.xlu1 %v1220_v48, %s2341_s20  ;;  %607 = vrot.lane.b32.xlu2 %v600_v49, %s2337_s15 }
  0x67   : > { %508 = vrot.lane.b32.xlu1 %v501_v50, %s2338_s24 }
  0x69   : > { %v1129_v51 = vpop.permute.xlu2 %1128 }
  0x71   : > { %v2508_v52 = vpop.permute.xlu2 %1027 }
  0x79   : > { %v2510_v53 = vpop.permute.xlu2 %930 }
  0x7f   : > { %v351_v54 = vpop.permute.xlu0 %350 }
  0x81   : > { %v2512_v55 = vpop.permute.xlu1 %1124  ;;  %v2514_v56 = vpop.permute.xlu2 %796 }
  0x82   : > { %v813_v57 = vmul.f32 0.0, %v2514_v56 }
  0x84   : > { %v2076_v58 = vpack.i.bf16 %v813_v57, %v813_v57 }
  0x86   : > { %2077 = vrot.lane.b32.xlu1 %v2076_v58, %s2339_s29 }
  0x87   : > { %v346_v59 = vpop.permute.xlu0 %345 }
  0x89   : > { %v2518_v60 = vpop.permute.xlu1 %1126  ;;  %v700_v61 = vpop.permute.xlu2 %699 }
  0x8a   : > { %v715_v62 = vmul.f32 0.0, %v700_v61  ;;  %v1133_v26 = vsel %vm609_vm2, %v2518_v60, %v1129_v51 }
  0x8c   : > { %v2081_v63 = vpack.i.bf16 %v715_v62, %v715_v62 }
  0x8e   : > { %2082 = vrot.lane.b32.xlu0 %v2081_v63, %s2338_s24 }
  0x8f   : > { %v1030_v0 = vpop.permute.xlu0 %1029 }
  0x90   : > { %v2546_v27 = vsel %vm510_vm3, %v2508_v52, %v1030_v0 }
  0x91   : > { %v2521_v1 = vpop.permute.xlu1 %1031  ;;  %v1131_v2 = vpop.permute.xlu2 %1130 }
  0x92   : > { %v2533_v15 = vmul.f32 0.0, %v1131_v2  ;;  %v1134_v18 = vsel %vm609_vm2, %v1129_v51, %v1131_v2  ;;  %v2576_v45 = vsel %vm510_vm3, %v1030_v0, %v2521_v1 }
  0x97   : > { %v933_v3 = vpop.permute.xlu0 %932  ;;  %v395_v6 = vpop.f32.mrf.mxu0 }
  0x98   : > { %v418_v7 = vpop.f32.mrf.mxu1  ;;  %v396_v20 = vadd.f32 %v395_v6, %v346_v59  ;;  %v2590_v49 = vsel %vm853_vm5, %v2510_v53, %v933_v3  ;;  %v2630_v6 = vsel %vm609_vm2, %v2512_v55, %v2518_v60 }
  0x99   : > { %v2523_v4 = vpop.permute.xlu1 %934  ;;  %v2525_v5 = vpop.permute.xlu2 %605  ;;  %v419_v21 = vadd.f32 %v418_v7, %v346_v59 }
  0x9a   : > { %v2548_v30 = vmax.f32 %v396_v20, 0.0  ;;  %v2594_v50 = vsel %vm853_vm5, %v933_v3, %v2523_v4 }
  0x9b   : > { %v2550_v31 = vmax.f32 %v419_v21, 0.0 }
  0x9c   : > { %v1043_v51 = vmul.f32 %v2508_v52, %v2548_v30 }
  0x9d   : > { %v1141_v20 = vmul.f32 %v2630_v6, %v2550_v31 }
  0x9e   : > { %v441_v8 = vpop.f32.mrf.mxu2  ;;  %v464_v9 = vpop.f32.mrf.mxu3 }
  0x9f   : > { %v465_v10 = vadd.f32 %v464_v9, %v346_v59  ;;  %v2527_v11 = vpop.permute.xlu0 %798  ;;  %v398_v14 = vpop.f32.mrf.mxu0  ;;  %v442_v36 = vadd.f32 %v441_v8, %v346_v59 }
  0xa0   : > { %v421_v17 = vpop.f32.mrf.mxu1  ;;  %v399_v19 = vadd.f32 %v398_v14, %v351_v54  ;;  %v805_v14 = vsel %vm804_vm6, %v2514_v56, %v2527_v11 }
  0xa1   : > { %v2529_v12 = vpop.permute.xlu1 %800  ;;  %v2531_v13 = vpop.permute.xlu2 %504  ;;  %v2535_v16 = vmax.f32 %v465_v10, 0.0  ;;  %v422_v23 = vadd.f32 %v421_v17, %v351_v54  ;;  %v2601_v57 = vmax.f32 %v442_v36, 0.0 }
  0xa2   : > { %v2539_v24 = vmax.f32 %v399_v19, 0.0  ;;  %v806_v17 = vsel %vm804_vm6, %v2527_v11, %v2529_v12 }
  0xa3   : > { %v1143_v22 = vmul.f32 %v1134_v18, %v2535_v16  ;;  %v2555_v37 = vmax.f32 %v422_v23, 0.0  ;;  %v1142_v19 = vmul.f32 %v1133_v26, %v2601_v57  ;;  %v815_v36 = vmul.f32 %v806_v17, %v2550_v31 }
  0xa4   : > { %v1048_v44 = vmul.f32 %v2508_v52, %v2539_v24  ;;  %v819_v21 = vmul.f32 %v805_v14, %v2539_v24 }
  0xa5   : > { %v2121_v25 = vpack.i.bf16 %v2533_v15, %v1143_v22  ;;  %v2605_v59 = vmul.f32 %v2546_v27, %v2555_v37  ;;  %v2613_v63 = vmul.f32 %v2590_v49, %v2555_v37  ;;  %v820_v22 = vmul.f32 %v806_v17, %v2555_v37 }
  0xa6   : > { %v444_v28 = vpop.f32.mrf.mxu2  ;;  %v467_v29 = vpop.f32.mrf.mxu3  ;;  %v2136_v62 = vpack.i.bf16 %v1043_v51, %v1048_v44 }
  0xa7   : > { %v445_v32 = vadd.f32 %v444_v28, %v351_v54  ;;  %v468_v33 = vadd.f32 %v467_v29, %v351_v54  ;;  %v702_v34 = vpop.permute.xlu0 %701  ;;  %2122 = vrot.lane.b32.xlu1 %v2121_v25, %s2337_s15  ;;  %v2106_v29 = vpack.i.bf16 %v1142_v19, %v1141_v20 }
  0xa8   : > { %v2558_v38 = vsel %vm559_vm4, %v700_v61, %v702_v34 }
  0xa9   : > { %v2553_v35 = vpop.permute.xlu1 %703  ;;  %v2564_v40 = vpop.permute.xlu2 %1221  ;;  %v2566_v41 = vmax.f32 %v445_v32, 0.0  ;;  %v2568_v42 = vmax.f32 %v468_v33, 0.0  ;;  %v716_v43 = vmul.f32 %v2558_v38, %v2548_v30  ;;  %v2146_v32 = vpack.i.bf16 %v820_v22, %v819_v21 }
  0xaa   : > { %v2562_v39 = vsel %vm559_vm4, %v702_v34, %v2553_v35  ;;  %v2582_v47 = vmul.f32 %v2564_v40, %v2548_v30  ;;  %v2586_v48 = vmul.f32 %v2564_v40, %v2539_v24  ;;  %v814_v34 = vmul.f32 %v805_v14, %v2548_v30 }
  0xab   : > { %v717_v46 = vmul.f32 %v2562_v39, %v2550_v31  ;;  %v2599_v54 = vmul.f32 %v1133_v26, %v2566_v41  ;;  %v2609_v61 = vmul.f32 %v2576_v45, %v2566_v41  ;;  %v2617_v52 = vmul.f32 %v2594_v50, %v2566_v41 }
  0xac   : > { %v2620_v0 = vmul.f32 %v1134_v18, %v2568_v42  ;;  %v2216_v3 = vpack.i.bf16 %v2582_v47, %v2586_v48  ;;  %v2091_v19 = vpack.i.bf16 %v815_v36, %v814_v34 }
  0xad   : > { %v2096_v58 = vpack.i.bf16 %v717_v46, %v716_v43  ;;  %v2171_v2 = vpack.i.bf16 %v2609_v61, %v2605_v59  ;;  %v2191_v9 = vpack.i.bf16 %v2617_v52, %v2613_v63 }
  0xae   : > { %v2196_v10 = vpack.i.bf16 %v2533_v15, %v2620_v0 }
  0xaf   : > { %2097 = vrot.lane.b32.xlu0 %v2096_v58, %s2338_s24  ;;  %v602_v7 = vpop.permute.xlu0 %601  ;;  %2137 = vrot.lane.b32.xlu1 %v2136_v62, %s2341_s20 }
  0xb0   : > { %v618_v60 = vmul.f32 0.0, %v602_v7 }
  0xb1   : > { %v604_v8 = vpop.permute.xlu1 %603  ;;  %v803_v18 = vpop.permute.xlu2 %802 }
  0xb2   : > { %v2086_v23 = vpack.i.bf16 %v618_v60, %v618_v60  ;;  %v807_v25 = vsel %vm804_vm6, %v2529_v12, %v803_v18  ;;  %v2651_v56 = vmul.f32 %v803_v18, %v2535_v16  ;;  %v2654_v11 = vmul.f32 %v803_v18, %v2568_v42 }
  0xb3   : > { %v2657_v28 = vmul.f32 %v807_v25, %v2601_v57  ;;  %v2660_v26 = vmul.f32 %v807_v25, %v2566_v41  ;;  %v610_v20 = vsel %vm609_vm2, %v602_v7, %v604_v8  ;;  %v611_v21 = vsel %vm609_vm2, %v604_v8, %v2525_v5 }
  0xb4   : > { %2087 = vrot.lane.b32.xlu2 %v2086_v23, %s2337_s15  ;;  %v1045_v25 = vmul.f32 %v2576_v45, %v2601_v57 }
  0xb5   : > { %v2226_v33 = vpack.i.bf16 %v2654_v11, %v2660_v26  ;;  %v3349_v47 = vpack.i.bf16 %v2651_v56, %v2657_v28  ;;  %v1377_v56 = vld [vmem:[%s3340_s4] sm:$0xff] }
  0xb7   : > { %2107 = vrot.lane.b32.xlu0 %v2106_v29, %s2337_s15  ;;  %v1034_v43 = vpop.permute.xlu0 %1033  ;;  %2147 = vrot.lane.b32.xlu1 %v2146_v32, %s2339_s29  ;;  %v619_v29 = vmul.f32 %v610_v20, %v2548_v30  ;;  %v620_v32 = vmul.f32 %v611_v21, %v2550_v31 }
  0xb8   : > { %v2675_v46 = vsel %vm510_vm3, %v2521_v1, %v1034_v43  ;;  %v2677_v51 = vmul.f32 0.0, %v1034_v43  ;;  %v1145_v43 = vmul.f32 %v2512_v55, %v2539_v24 }
  0xb9   : > { %v2671_v44 = vpop.permute.xlu1 %502  ;;  %v608_v58 = vpop.permute.xlu2 %607  ;;  %v1046_v62 = vmul.f32 %v2675_v46, %v2535_v16 }
  0xba   : > { %v612_v14 = vsel %vm609_vm2, %v2525_v5, %v608_v58  ;;  %v2684_v17 = vmul.f32 %v608_v58, %v2535_v16  ;;  %v2693_v1 = vmul.f32 %v608_v58, %v2568_v42  ;;  %v2709_v7 = vsel %vm510_vm3, %v2671_v44, %v2531_v13 }
  0xbb   : > { %v2687_v60 = vmul.f32 %v612_v14, %v2601_v57  ;;  %v2690_v18 = vmul.f32 %v612_v14, %v2566_v41  ;;  %v2126_v22 = vpack.i.bf16 %v2677_v51, %v1046_v62  ;;  %v525_v58 = vmul.f32 %v2709_v7, %v2539_v24 }
  0xbc   : > { %2092 = vrot.lane.b32.xlu2 %v2091_v19, %s2339_s29  ;;  %v2101_v19 = vpack.i.bf16 %v620_v32, %v619_v29  ;;  %v1044_v29 = vmul.f32 %v2546_v27, %v2550_v31  ;;  %v1146_v32 = vmul.f32 %v2630_v6, %v2555_v37  ;;  %v948_v6 = vmul.f32 %v2594_v50, %v2601_v57 }
  0xbd   : > { %v519_v59 = vmul.f32 0.0, %v2671_v44  ;;  %v3348_v15 = vpack.i.bf16 %v2684_v17, %v2687_v60  ;;  %v3350_v48 = vpack.i.bf16 %v2693_v1, %v2690_v18 }
  0xbf   : > { %2127 = vrot.lane.b32.xlu0 %v2126_v22, %s2341_s20  ;;  %v507_v5 = vpop.permute.xlu0 %506  ;;  %v2201_v61 = vpack.i.bf16 %v519_v59, %v519_v59 }
  0xc0   : > { %v2714_v34 = vsel %vm510_vm3, %v2531_v13, %v507_v5  ;;  %v1140_v13 = vmul.f32 %v2512_v55, %v2548_v30  ;;  %v951_v55 = vmul.f32 %v2510_v53, %v2539_v24 }
  0xc1   : > { %v937_v8 = vpop.permute.xlu1 %936  ;;  %v526_v62 = vmul.f32 %v2714_v34, %v2555_v37 }
  0xc2   : > { %v940_v36 = vsel %vm853_vm5, %v2523_v4, %v937_v8  ;;  %v2131_v4 = vpack.i.bf16 %v1140_v13, %v1145_v43  ;;  %v2111_v43 = vpack.i.bf16 %v1045_v25, %v1044_v29 }
  0xc3   : > { %v2725_v14 = vmul.f32 %v940_v36, %v2568_v42  ;;  %v2161_v22 = vpack.i.bf16 %v526_v62, %v525_v58  ;;  %v946_v58 = vmul.f32 %v2510_v53, %v2548_v30  ;;  %v2166_v62 = vpack.i.bf16 %v2599_v54, %v1146_v32 }
  0xc4   : > { %2102 = vrot.lane.b32.xlu2 %v2101_v19, %s2337_s15  ;;  %v721_v53 = vmul.f32 %v2558_v38, %v2539_v24 }
  0xc5   : > { %2162 = vrot.lane.b32.xlu1 %v2161_v22, %s2341_s20  ;;  %v2141_v27 = vpack.i.bf16 %v946_v58, %v951_v55  ;;  %v722_v22 = vmul.f32 %v2562_v39, %v2555_v37  ;;  %v624_v39 = vmul.f32 %v610_v20, %v2539_v24 }
  0xc7   : > { %2132 = vrot.lane.b32.xlu0 %v2131_v4, %s2337_s15  ;;  %v1224_v12 = vpop.permute.xlu0 %1223 }
  0xc8   : > { %v1229_v45 = vsel %vm559_vm4, %v2564_v40, %v1224_v12 }
  0xc9   : > { %v2734_v23 = vpop.permute.xlu1 %1225  ;;  %v1238_v54 = vmul.f32 %v1229_v45, %v2550_v31 }
  0xca   : > { %v1230_v19 = vsel %vm559_vm4, %v1224_v12, %v2734_v23  ;;  %v947_v12 = vmul.f32 %v2590_v49, %v2550_v31  ;;  %v2151_v49 = vpack.i.bf16 %v722_v22, %v721_v53 }
  0xcb   : > { %v1239_v40 = vmul.f32 %v1230_v19, %v2601_v57 }
  0xcc   : > { %2112 = vrot.lane.b32.xlu2 %v2111_v43, %s2341_s20  ;;  %v2116_v32 = vpack.i.bf16 %v948_v6, %v947_v12  ;;  %v949_v6 = vmul.f32 %v940_v36, %v2535_v16 }
  0xcd   : > { %2167 = vrot.lane.b32.xlu1 %v2166_v62, %s2337_s15  ;;  %v2186_v43 = vpack.i.bf16 %v1239_v40, %v1238_v54 }
  0xcf   : > { %2142 = vrot.lane.b32.xlu0 %v2141_v27, %s2340_s16  ;;  %v706_v25 = vpop.permute.xlu0 %705  ;;  %v1051_v27 = vmul.f32 %v2675_v46, %v2568_v42 }
  0xd0   : > { %v709_v4 = vsel %vm559_vm4, %v2553_v35, %v706_v25  ;;  %v719_v50 = vmul.f32 %v706_v25, %v2535_v16  ;;  %v724_v29 = vmul.f32 %v706_v25, %v2568_v42  ;;  %v625_v35 = vmul.f32 %v611_v21, %v2555_v37 }
  0xd1   : > { %v1228_v13 = vpop.permute.xlu1 %1227  ;;  %v718_v38 = vmul.f32 %v709_v4, %v2601_v57  ;;  %v723_v55 = vmul.f32 %v709_v4, %v2566_v41  ;;  %v950_v25 = vmul.f32 0.0, %v937_v8  ;;  %v2206_v22 = vpack.i.bf16 %v2677_v51, %v1051_v27 }
  0xd2   : > { %v2156_v21 = vpack.i.bf16 %v625_v35, %v624_v39  ;;  %v1244_v8 = vmul.f32 %v1230_v19, %v2566_v41  ;;  %v521_v51 = vmul.f32 %v2714_v34, %v2550_v31  ;;  %v1231_v63 = vsel %vm559_vm4, %v2734_v23, %v1228_v13 }
  0xd3   : > { %v2241_v58 = vpack.i.bf16 %v719_v50, %v718_v38  ;;  %v2236_v62 = vpack.i.bf16 %v724_v29, %v723_v55  ;;  %v2181_v46 = vpack.i.bf16 %v950_v25, %v949_v6  ;;  %v2211_v38 = vpack.i.bf16 %v950_v25, %v2725_v14 }
  0xd4   : > { %2117 = vrot.lane.b32.xlu2 %v2116_v32, %s2340_s16  ;;  %v1241_v52 = vmul.f32 0.0, %v1228_v13  ;;  %v1245_v0 = vmul.f32 %v1231_v63, %v2568_v42 }
  0xd5   : > { %2187 = vrot.lane.b32.xlu1 %v2186_v43, %s2338_s24 }
  0xd7   : > { %2152 = vrot.lane.b32.xlu0 %v2151_v49, %s2338_s24 }
  0xd9   : > { %v509_v4 = vpop.permute.xlu1 %508 }
  0xda   : > { %v513_v54 = vsel %vm510_vm3, %v507_v5, %v509_v4  ;;  %v523_v40 = vmul.f32 %v509_v4, %v2535_v16  ;;  %v528_v53 = vmul.f32 %v509_v4, %v2568_v42  ;;  %v1243_v5 = vmul.f32 %v1229_v45, %v2555_v37 }
  0xdb   : > { %v522_v12 = vmul.f32 %v513_v54, %v2601_v57  ;;  %v527_v20 = vmul.f32 %v513_v54, %v2566_v41  ;;  %v520_v45 = vmul.f32 %v2709_v7, %v2548_v30 }
  0xdc   : > { %2157 = vrot.lane.b32.xlu2 %v2156_v21, %s2337_s15  ;;  %v2221_v36 = vpack.i.bf16 %v1244_v8, %v1243_v5 }
  0xdd   : > { %v2271_v50 = vpack.i.bf16 %v523_v40, %v522_v12  ;;  %v2266_v29 = vpack.i.bf16 %v528_v53, %v527_v20  ;;  %2207 = vrot.lane.b32.xlu1 %v2206_v22, %s2341_s20  ;;  %v2176_v19 = vpack.i.bf16 %v521_v51, %v520_v45 }
  0xdf   : > { %2182 = vrot.lane.b32.xlu0 %v2181_v46, %s2340_s16 }
  0xe4   : > { %2172 = vrot.lane.b32.xlu2 %v2171_v2, %s2341_s20  ;;  %v2251_v2 = vpack.i.bf16 %v1241_v52, %v1245_v0 }
  0xe5   : > { %2222 = vrot.lane.b32.xlu1 %v2221_v36, %s2338_s24 }
  0xe7   : > { %2192 = vrot.lane.b32.xlu0 %v2191_v9, %s2340_s16 }
  0xec   : > { %2177 = vrot.lane.b32.xlu2 %v2176_v19, %s2341_s20 }
  0xed   : > { %2227 = vrot.lane.b32.xlu1 %v2226_v33, %s2339_s29 }
  0xef   : > { %2212 = vrot.lane.b32.xlu0 %v2211_v38, %s2340_s16  ;;  %s2342_s16 = smov 1  }
  0xf4   : > { %2197 = vrot.lane.b32.xlu2 %v2196_v10, %s2337_s15 }
  0xf5   : > { %2242 = vrot.lane.b32.xlu1 %v2241_v58, %s2338_s24 }
  0xf7   : > { %2217 = vrot.lane.b32.xlu0 %v2216_v3, %s2338_s24  ;;  %v1240_v3 = vmul.f32 %v1231_v63, %v2535_v16 }
  0xf8   : > { %v2840_v10 = vpop.permute.xlu1 %2077 }
  0xf9   : > { %v2261_v11 = vpack.i.bf16 %v1241_v52, %v1240_v3  ;;  %v2080_v33 = vunpack.i.h.bf16 %v2840_v10 }
  0xfc   : > { %2202 = vrot.lane.b32.xlu2 %v2201_v61, %s2341_s20 }
  0xfd   : > { %2257 = vrot.lane.b32.xlu1 %v3348_v15, %s2337_s15 }
  0xff   : > { %2237 = vrot.lane.b32.xlu0 %v2236_v62, %s2338_s24 }
 0x100   : > { %v2848_v26 = vpop.permute.xlu0 %2082 }
 0x101   : > { %v2085_v34 = vunpack.i.h.bf16 %v2848_v26 }
 0x104   : > { %2232 = vrot.lane.b32.xlu2 %v3349_v47, %s2339_s29 }
 0x105   : > { %2272 = vrot.lane.b32.xlu1 %v2271_v50, %s2341_s20 }
 0x107   : > { %2252 = vrot.lane.b32.xlu0 %v2251_v2, %s2338_s24 }
 0x10c   : > { %2247 = vrot.lane.b32.xlu2 %v3350_v48, %s2337_s15 }
 0x10e   : > { %v2837_v9 = vpop.permute.xlu2 %2087 }
 0x10f   : > { %2267 = vrot.lane.b32.xlu0 %v2266_v29, %s2341_s20  ;;  %v2090_v1 = vunpack.i.h.bf16 %v2837_v9 }
 0x114   : > { %2262 = vrot.lane.b32.xlu2 %v2261_v11, %s2338_s24 }
 0x116   : > { %v2846_v28 = vpop.permute.xlu2 %2092 }
 0x117   : > { %1381 = vperm.xlu0 %2075, %v1377_v56   ;;  %v2094_v44 = vunpack.i.l.bf16 %v2846_v28 }
 0x119   : > { %v2855_v17 = vsel %vm853_vm5, %v2080_v33, %v2094_v44  ;;  %v2857_v60 = vpop.permute.xlu1 %2122 }
 0x11e   : > { %v2859_v18 = vpop.permute.xlu2 %2102 }
 0x11f   : > { %v2104_v23 = vunpack.i.l.bf16 %v2859_v18 }
 0x121   : > { %v2863_v7 = vpop.permute.xlu0 %2097  ;;  %v2870_v13 = vsel %vm609_vm2, %v2090_v1, %v2104_v23  ;;  %v2138_v32 = vpop.permute.xlu1 %2137 }
 0x122   : > { %v2099_v14 = vunpack.i.l.bf16 %v2863_v7  ;;  %v2139_v8 = vunpack.i.l.bf16 %v2138_v32  ;;  %v2140_v38 = vunpack.i.h.bf16 %v2138_v32 }
 0x124   : > { %v2875_v55 = vsel %vm510_vm3, %v2085_v34, %v2099_v14 }
 0x126   : > { %v2877_v43 = vpop.permute.xlu2 %2112 }
 0x127   : > { %v2115_v36 = vunpack.i.h.bf16 %v2877_v43  ;;  %v2114_v51 = vunpack.i.l.bf16 %v2877_v43 }
 0x129   : > { %v2879_v58 = vpop.permute.xlu0 %2107  ;;  %v2883_v49 = vpop.permute.xlu1 %2147  ;;  %v1083_v0 = vsel %vm559_vm4, %v2140_v38, %v2114_v51  ;;  %v1084_v2 = vsel %vm559_vm4, %v2114_v51, %v2115_v36 }
 0x12a   : > { %v2110_v6 = vunpack.i.h.bf16 %v2879_v58  ;;  %v2109_v54 = vunpack.i.l.bf16 %v2879_v58 }
 0x12c   : > { %v1181_v19 = vsel %vm609_vm2, %v2109_v54, %v2110_v6 }
 0x12e   : > { %v2881_v62 = vpop.permute.xlu2 %2117 }
 0x12f   : > { %v2120_v11 = vunpack.i.h.bf16 %v2881_v62  ;;  %v2119_v56 = vunpack.i.l.bf16 %v2881_v62 }
 0x131   : > { %v2885_v39 = vpop.permute.xlu0 %2127 }
 0x136   : > { %v2887_v35 = vpop.permute.xlu2 %2157 }
 0x137   : > { %v2889_v27 = vpop.permute.xlu1 %2162 }
 0x139   : > { %v2133_v25 = vpop.permute.xlu0 %2132 }
 0x13a   : > { %v2135_v53 = vunpack.i.h.bf16 %v2133_v25  ;;  %v2134_v12 = vunpack.i.l.bf16 %v2133_v25 }
 0x13c   : > { %v1180_v45 = vsel %vm609_vm2, %v2135_v53, %v2109_v54 }
 0x13e   : > { %v2891_v4 = vpop.permute.xlu2 %2172 }
 0x13f   : > { %v2895_v40 = vpop.permute.xlu1 %2167  ;;  %v2175_v50 = vunpack.i.h.bf16 %v2891_v4  ;;  %v2174_v29 = vunpack.i.l.bf16 %v2891_v4 }
 0x140   : > { %v2170_v20 = vunpack.i.h.bf16 %v2895_v40  ;;  %v2169_v21 = vunpack.i.l.bf16 %v2895_v40  ;;  %v3087_v40 = vld [vmem:[%s3339_s3] sm:$0xff] }
 0x141   : > { %v2143_v22 = vpop.permute.xlu0 %2142  ;;  %v1087_v61 = vsel %vm559_vm4, %v2139_v8, %v2174_v29  ;;  %v1088_v63 = vsel %vm559_vm4, %v2174_v29, %v2175_v50 }
 0x142   : > { %v1184_v46 = vsel %vm609_vm2, %v2134_v12, %v2169_v21  ;;  %v1185_v5 = vsel %vm609_vm2, %v2169_v21, %v2170_v20  ;;  %v2145_v53 = vunpack.i.h.bf16 %v2143_v22  ;;  %v2144_v12 = vunpack.i.l.bf16 %v2143_v22 }
 0x143   : > { %1396 = vmatpush.msrb.mxu0 %v1184_v46  ;;  %1442 = vmatpush.msrb.mxu2 %v1185_v5  ;;  %v2946_v46 = vld [vmem:[%s3343_s7 + $0x4] ss:$8 sm:$0xf]  ;;  %v2951_v5 = vld [vmem:[%s3344_s8 + $0x2] ss:$4 sm:$0xf] }
 0x144   : > { %v1742_v51 = vperm.slane %v2951_v5, 0  ;;  %v891_v43 = vperm.slane %v2946_v46, 2 }
 0x145   : > { %1397 = vmatpush.msrb.mxu0 %v1180_v45  ;;  %1443 = vmatpush.msrb.mxu2 %v1181_v19 }
 0x146   : > { %v2911_v59 = vpop.permute.xlu2 %2177  ;;  %1746 = vrot.lane.b32.xlu1 %v1742_v51, %s2342_s16 }
 0x147   : > { %v2917_v15 = vpop.permute.xlu1 %2187  ;;  %1398 = vmatpush.msrb.mxu0 %v1087_v61  ;;  %1444 = vmatpush.msrb.mxu2 %v1088_v63  ;;  %v889_v61 = vperm.slane %v2946_v46, 0  ;;  %v890_v63 = vperm.slane %v2946_v46, 1 }
 0x148   : > { %v2190_v1 = vunpack.i.h.bf16 %v2917_v15  ;;  %v2189_v34 = vunpack.i.l.bf16 %v2917_v15 }
 0x149   : > { %v2919_v52 = vpop.permute.xlu0 %2152  ;;  %1399 = vmatpush.msrb.mxu0 %v1083_v0  ;;  %1445 = vmatpush.msrb.mxu2 %v1084_v2  ;;  %v2975_v0 = vld [vmem:[%s3339_s3 + $0x8] sm:$0xff]  ;;  %v986_v2 = vsel %vm804_vm6, %v2145_v53, %v2119_v56  ;;  %v2079_v53 = vunpack.i.l.bf16 %v2840_v10  ;;  %v898_v51 = vmul.f32 %v890_v63, %v2550_v31 }
 0x14a   : > { %v1278_v38 = vsel %vm510_vm3, %v2189_v34, %v2190_v1 }
 0x14e   : > { %v2927_v48 = vpop.permute.xlu2 %2197 }
 0x14f   : > { %v2925_v47 = vpop.permute.xlu1 %2207 }
 0x151   : > { %v2929_v3 = vpop.permute.xlu0 %2182 }
 0x156   : > { %v2953_v8 = vpop.permute.xlu2 %2202 }
 0x157   : > { %v2933_v33 = vpop.permute.xlu1 %2222 }
 0x158   : > { %v2225_v32 = vunpack.i.h.bf16 %v2933_v33  ;;  %v2224_v25 = vunpack.i.l.bf16 %v2933_v33  ;;  %v892_v33 = vperm.slane %v2946_v46, 3 }
 0x159   : > { %v2939_v54 = vpop.permute.xlu0 %2192 }
 0x15a   : > { %v2195_v21 = vunpack.i.h.bf16 %v2939_v54  ;;  %v2194_v29 = vunpack.i.l.bf16 %v2939_v54  ;;  %v1282_v22 = vsel %vm510_vm3, %v2224_v25, %v2225_v32  ;;  %v900_v15 = vmul.f32 %v892_v33, %v2535_v16 }
 0x15b   : > { %1479 = vmatpush.msrb.mxu3 %v1282_v22  ;;  %v901_v22 = vmul.f32 %v889_v61, %v2539_v24  ;;  %v2997_v24 = vld [vmem:[%s3344_s8] ss:$4 sm:$0xf]  ;;  %v3351_v16 = vunpack.i.h.bf16 %v2919_v52 }
 0x15c   : > { %v990_v45 = vsel %vm804_vm6, %v2144_v12, %v2194_v29  ;;  %v991_v19 = vsel %vm804_vm6, %v2194_v29, %v2195_v21  ;;  %v987_v12 = vsel %vm804_vm6, %v2119_v56, %v2120_v11  ;;  %v2149_v29 = vunpack.i.l.bf16 %v2883_v49 }
 0x15d   : > { %1400 = vmatpush.msrb.mxu0 %v990_v45  ;;  %1446 = vmatpush.msrb.mxu2 %v991_v19  ;;  %v902_v45 = vmul.f32 %v890_v63, %v2555_v37  ;;  %v2150_v19 = vunpack.i.h.bf16 %v2883_v49  ;;  %v897_v56 = vmul.f32 %v889_v61, %v2548_v30  ;;  %v1609_v10 = vperm.slane %v2997_v24, 1  ;;  %v3012_v63 = vld [vmem:[%s3339_s3 + $0x18] sm:$0xff] }
 0x15e   : > { %1480 = vmatpush.msrb.mxu3 %v1278_v38  ;;  %v858_v37 = vsel %vm853_vm5, %v2079_v53, %v2149_v29  ;;  %v1608_v31 = vperm.slane %v2997_v24, 0  ;;  %v3007_v61 = vpop.permute.xlu2 %2232  ;;  %v3347_v53 = vunpack.i.h.bf16 %v2863_v7 }
 0x15f   : > { %1401 = vmatpush.msrb.mxu0 %v986_v2  ;;  %1447 = vmatpush.msrb.mxu2 %v987_v12  ;;  %v2095_v2 = vunpack.i.h.bf16 %v2846_v28  ;;  %v3346_v12 = vunpack.i.h.bf16 %v2919_v52  ;;  %v859_v30 = vsel %vm853_vm5, %v2149_v29, %v2150_v19 }
 0x160   : > { %2043 = vmatmul.msk.f32.vlgmr.msrb.gmra.mxu3 %vm1389_vm7, %v2975_v0  ;;  %1614 = vrot.lane.b32.xlu1 %v1609_v10, %s2343_s22 }
 0x161   : > { %v2989_v38 = vpop.permute.xlu0 %2212  ;;  %1402 = vmatpush.msrb.mxu0 %v901_v22  ;;  %1448 = vmatpush.msrb.mxu2 %v902_v45  ;;  %v2154_v22 = vunpack.i.l.bf16 %v2919_v52  ;;  %v2084_v45 = vunpack.i.l.bf16 %v2848_v26  ;;  %v855_v29 = vsel %vm853_vm5, %v2094_v44, %v2095_v2  ;;  %v2089_v44 = vunpack.i.l.bf16 %v2837_v9 }
 0x162   : > { %1612 = vrot.lane.b32.xlu0 %v1608_v31, %s2343_s22  ;;  %v2199_v9 = vunpack.i.l.bf16 %v2927_v48 }
 0x163   : > { %1403 = vmatpush.msrb.mxu0 %v897_v56  ;;  %1449 = vmatpush.msrb.mxu2 %v898_v51  ;;  %v2159_v56 = vunpack.i.l.bf16 %v2887_v35  ;;  %v759_v26 = vsel %vm510_vm3, %v2084_v45, %v2154_v22  ;;  %v760_v51 = vsel %vm510_vm3, %v2154_v22, %v3346_v12  ;;  %v756_v22 = vsel %vm510_vm3, %v2099_v14, %v3347_v53 }
 0x164   : > { %v1610_v45 = vperm.slane %v2997_v24, 2  ;;  %v2165_v12 = vunpack.i.h.bf16 %v2889_v27  ;;  %v2164_v14 = vunpack.i.l.bf16 %v2889_v27 }
 0x165   : > { %1404 = vmatpush.msrb.mxu0 %v858_v37  ;;  %1450 = vmatpush.msrb.mxu2 %v859_v30  ;;  %v2160_v37 = vunpack.i.h.bf16 %v2887_v35 }
 0x167   : > { %1405 = vmatpush.msrb.mxu0 %v2855_v17  ;;  %1451 = vmatpush.msrb.mxu2 %v855_v29  ;;  %v3033_v17 = vpop.permute.xlu1 %2227  ;;  %v2105_v29 = vunpack.i.h.bf16 %v2859_v18  ;;  %v663_v53 = vsel %vm609_vm2, %v2159_v56, %v2160_v37 }
 0x168   : > { %2044 = vmatmul.msk.f32.gmra.mxu3 %vm1389_vm7, %v3012_v63  ;;  %1616 = vrot.lane.b32.xlu1 %v1610_v45, %s2343_s22  ;;  %v565_v45 = vsel %vm559_vm4, %v2164_v14, %v2165_v12  ;;  %v2230_v46 = vunpack.i.h.bf16 %v3033_v17 }
 0x169   : > { %v2218_v10 = vpop.permute.xlu0 %2217  ;;  %1406 = vmatpush.msrb.mxu0 %v759_v26  ;;  %1452 = vmatpush.msrb.mxu2 %v760_v51  ;;  %v2204_v26 = vunpack.i.l.bf16 %v2953_v8  ;;  %v662_v51 = vsel %vm609_vm2, %v2089_v44, %v2159_v56 }
 0x16a   : > { %v2220_v30 = vunpack.i.h.bf16 %v2218_v10  ;;  %v2219_v31 = vunpack.i.l.bf16 %v2218_v10 }
 0x16b   : > { %1407 = vmatpush.msrb.mxu0 %v2875_v55  ;;  %1453 = vmatpush.msrb.mxu2 %v756_v22  ;;  %v2124_v55 = vunpack.i.l.bf16 %v2857_v60  ;;  %v2205_v22 = vunpack.i.h.bf16 %v2953_v8  ;;  %v659_v8 = vsel %vm609_vm2, %v2104_v23, %v2105_v29  ;;  %v564_v56 = vsel %vm559_vm4, %v2204_v26, %v2164_v14 }
 0x16c   : > { %v1281_v10 = vsel %vm510_vm3, %v2219_v31, %v2224_v25  ;;  %v1277_v44 = vsel %vm510_vm3, %v2220_v30, %v2189_v34  ;;  %v2180_v25 = vunpack.i.h.bf16 %v2911_v59  ;;  %v2179_v31 = vunpack.i.l.bf16 %v2911_v59 }
 0x16d   : > { %1408 = vmatpush.msrb.mxu0 %v662_v51  ;;  %1433 = vmatpush.msrb.mxu1 %v1281_v10  ;;  %v3062_v51 = vpop.permute.xlu2 %2247  ;;  %v1186_v34 = vsel %vm609_vm2, %v2170_v20, %v2199_v9  ;;  %v2200_v30 = vunpack.i.h.bf16 %v2927_v48  ;;  %v1182_v23 = vsel %vm609_vm2, %v2110_v6, %v2124_v55  ;;  %v2129_v20 = vunpack.i.l.bf16 %v2885_v39 }
 0x16e   : > { %1454 = vmatpush.msrb.mxu2 %v663_v53  ;;  %v2209_v53 = vunpack.i.l.bf16 %v2925_v47  ;;  %v560_v48 = vsel %vm559_vm4, %v2205_v22, %v2179_v31  ;;  %v2125_v26 = vunpack.i.h.bf16 %v2857_v60  ;;  %v561_v58 = vsel %vm559_vm4, %v2179_v31, %v2180_v25 }
 0x16f   : > { %1409 = vmatpush.msrb.mxu0 %v2870_v13  ;;  %1434 = vmatpush.msrb.mxu1 %v1277_v44  ;;  %v2214_v6 = vunpack.i.l.bf16 %v2989_v38  ;;  %v3098_v10 = vpop.permute.xlu1 %2242  ;;  %v2210_v22 = vunpack.i.h.bf16 %v2925_v47  ;;  %v1187_v60 = vsel %vm609_vm2, %v2199_v9, %v2200_v30  ;;  %v2184_v44 = vunpack.i.l.bf16 %v2929_v3 }
 0x170   : > { %1455 = vmatpush.msrb.mxu2 %v659_v8  ;;  %2041 = vmatmul.msk.f32.vlgmr.msrb.gmra.mxu1 %vm1389_vm7, %v2975_v0  ;;  %v1089_v14 = vsel %vm559_vm4, %v2175_v50, %v2209_v53  ;;  %v1085_v31 = vsel %vm559_vm4, %v2115_v36, %v2129_v20  ;;  %v2130_v8 = vunpack.i.h.bf16 %v2885_v39  ;;  %v1183_v4 = vsel %vm609_vm2, %v2124_v55, %v2125_v26  ;;  %v1378_v39 = vld [vmem:[%s3340_s4 + $0x8] sm:$0xff] }
 0x171   : > { %1488 = vmatpush.msra.mxu1 %v1186_v34  ;;  %v3076_v13 = vpop.permute.xlu0 %2237  ;;  %1410 = vmatpush.msrb.mxu0 %v564_v56  ;;  %v992_v50 = vsel %vm804_vm6, %v2195_v21, %v2214_v6  ;;  %v2215_v47 = vunpack.i.h.bf16 %v2989_v38  ;;  %v1090_v34 = vsel %vm559_vm4, %v2209_v53, %v2210_v22  ;;  %v988_v54 = vsel %vm804_vm6, %v2120_v11, %v2184_v44  ;;  %v3128_v21 = vld [vmem:[%s3339_s3 + $0x10] sm:$0xff] }
 0x172   : > { %1456 = vmatpush.msrb.mxu2 %v565_v45  ;;  %v2185_v38 = vunpack.i.h.bf16 %v2929_v3  ;;  %v1086_v53 = vsel %vm559_vm4, %v2129_v20, %v2130_v8  ;;  %v903_v30 = vmul.f32 %v891_v43, %v2566_v41  ;;  %1386 = vperm.xlu2 %2276, %v1378_v39   ;;  %v899_v41 = vmul.f32 %v891_v43, %v2601_v57 }
 0x173   : > { %1489 = vmatpush.msra.mxu1 %v1182_v23  ;;  %1411 = vmatpush.msrb.mxu0 %v560_v48  ;;  %v2229_v48 = vunpack.i.l.bf16 %v3033_v17  ;;  %v993_v3 = vsel %vm804_vm6, %v2214_v6, %v2215_v47  ;;  %v904_v57 = vmul.f32 %v892_v33, %v2568_v42  ;;  %v2239_v22 = vunpack.i.l.bf16 %v3076_v13 }
 0x174   : > { %1457 = vmatpush.msrb.mxu2 %v561_v58  ;;  %1412 = vmatmul.f32.vlgmr.msrb.gmra.mxu0 %v3087_v40  ;;  %v989_v26 = vsel %vm804_vm6, %v2184_v44, %v2185_v38  ;;  %v1745_v58 = vperm.slane %v2951_v5, 3  ;;  %v1743_v44 = vperm.slane %v2951_v5, 1  ;;  %v2244_v42 = vunpack.i.l.bf16 %v3098_v10 }
 0x175   : > { %1458 = vmatmul.f32.vlgmr.msrb.gmra.mxu2 %v3087_v40  ;;  %1490 = vmatpush.msra.mxu1 %v1089_v14  ;;  %v2263_v9 = vpop.permute.xlu2 %2262  ;;  %v2249_v49 = vunpack.i.l.bf16 %v3062_v51 }
 0x176   : > { %1534 = vmatpush.msra.mxu0 %v1187_v60  ;;  %v2265_v45 = vunpack.i.h.bf16 %v2263_v9  ;;  %v2264_v62 = vunpack.i.l.bf16 %v2263_v9  ;;  %v860_v60 = vsel %vm853_vm5, %v2150_v19, %v2229_v48  ;;  %1752 = vrot.lane.b32.xlu0 %v1745_v58, %s2342_s16  ;;  %v2240_v19 = vunpack.i.h.bf16 %v3076_v13 }
 0x177   : > { %1491 = vmatpush.msra.mxu1 %v1085_v31  ;;  %v3143_v20 = vpop.permute.xlu1 %2257  ;;  %v861_v31 = vsel %vm853_vm5, %v2229_v48, %v2230_v46  ;;  %v3352_v13 = vunpack.i.h.bf16 %v2863_v7  ;;  %v664_v9 = vsel %vm609_vm2, %v2160_v37, %v2249_v49 }
 0x178   : > { %1535 = vmatpush.msra.mxu0 %v1183_v4  ;;  %2042 = vmatmul.msk.f32.gmra.mxu1 %vm1389_vm7, %v3012_v63  ;;  %v1279_v6 = vsel %vm510_vm3, %v2190_v1, %v2264_v62  ;;  %v1280_v14 = vsel %vm510_vm3, %v2264_v62, %v2265_v45  ;;  %v2235_v1 = vunpack.i.h.bf16 %v3007_v61  ;;  %v2259_v8 = vunpack.i.l.bf16 %v3143_v20 }
 0x179   : > { %1492 = vmatpush.msra.mxu1 %v992_v50  ;;  %v2253_v56 = vpop.permute.xlu0 %2252  ;;  %v757_v52 = vsel %vm510_vm3, %v3352_v13, %v2244_v42  ;;  %v2250_v50 = vunpack.i.h.bf16 %v3062_v51  ;;  %v2260_v7 = vunpack.i.h.bf16 %v3143_v20 }
 0x17a   : > { %1536 = vmatpush.msra.mxu0 %v1090_v34  ;;  %v2255_v36 = vunpack.i.h.bf16 %v2253_v56  ;;  %v2254_v55 = vunpack.i.l.bf16 %v2253_v56  ;;  %1748 = vrot.lane.b32.xlu2 %v1743_v44, %s2342_s16  ;;  %v1744_v34 = vperm.slane %v2951_v5, 2  ;;  %v660_v51 = vsel %vm609_vm2, %v2105_v29, %v2259_v8 }
 0x17b   : > { %1493 = vmatpush.msra.mxu1 %v988_v54  ;;  %v665_v37 = vsel %vm609_vm2, %v2249_v49, %v2250_v50  ;;  %v661_v39 = vsel %vm609_vm2, %v2259_v8, %v2260_v7 }
 0x17c   : > { %1537 = vmatpush.msra.mxu0 %v1086_v53  ;;  %v1283_v11 = vsel %vm510_vm3, %v2225_v32, %v2254_v55  ;;  %v1284_v23 = vsel %vm510_vm3, %v2254_v55, %v2255_v36  ;;  %v2234_v32 = vunpack.i.l.bf16 %v3007_v61  ;;  %v761_v61 = vsel %vm510_vm3, %v3351_v16, %v2239_v22 }
 0x17d   : > { %1415 = vmatmul.f32.gmra.mxu0 %v3128_v21  ;;  %1461 = vmatmul.f32.gmra.mxu2 %v3128_v21 }
 0x17e   : > { %1494 = vmatpush.msra.mxu1 %v903_v30  ;;  %1538 = vmatpush.msra.mxu0 %v993_v3  ;;  %v856_v17 = vsel %vm853_vm5, %v2095_v2, %v2234_v32  ;;  %v2245_v2 = vunpack.i.h.bf16 %v3098_v10  ;;  %v857_v4 = vsel %vm853_vm5, %v2234_v32, %v2235_v1  ;;  %v762_v10 = vsel %vm510_vm3, %v2239_v22, %v2240_v19 }
 0x17f   : > { %1525 = vmatpush.msra.mxu3 %v1283_v11  ;;  %1571 = vmatpush.msra.mxu2 %v1284_v23  ;;  %v2273_v47 = vpop.permute.xlu1 %2272 }
 0x180   : > { %1495 = vmatpush.msra.mxu1 %v899_v41  ;;  %1539 = vmatpush.msra.mxu0 %v989_v26  ;;  %v2274_v56 = vunpack.i.l.bf16 %v2273_v47  ;;  %v758_v43 = vsel %vm510_vm3, %v2244_v42, %v2245_v2  ;;  %v2275_v18 = vunpack.i.h.bf16 %v2273_v47 }
 0x181   : > { %1526 = vmatpush.msra.mxu3 %v1279_v6  ;;  %1572 = vmatpush.msra.mxu2 %v1280_v14  ;;  %v2268_v28 = vpop.permute.xlu0 %2267 }
 0x182   : > { %1496 = vmatpush.msra.mxu1 %v860_v60  ;;  %1540 = vmatpush.msra.mxu0 %v904_v57  ;;  %v2270_v35 = vunpack.i.h.bf16 %v2268_v28  ;;  %v562_v29 = vsel %vm559_vm4, %v2180_v25, %v2274_v56 }
 0x183   : > { %2045 = vmatmul.msk.f32.vlgmr.msra.gmra.mxu3 %vm1389_vm7, %v2975_v0  ;;  %1750 = vrot.lane.b32.xlu2 %v1744_v34, %s2342_s16 }
 0x184   : > { %1497 = vmatpush.msra.mxu1 %v856_v17  ;;  %1541 = vmatpush.msra.mxu0 %v900_v15 }
 0x185   : > { %2047 = vmatmul.msk.f32.vlgmr.msra.gmra.mxu2 %vm1389_vm7, %v2975_v0  ;;  %v2269_v0 = vunpack.i.l.bf16 %v2268_v28 }
 0x186   : > { %1498 = vmatpush.msra.mxu1 %v761_v61  ;;  %1542 = vmatpush.msra.mxu0 %v861_v31 }
 0x187   : > { %v566_v5 = vsel %vm559_vm4, %v2165_v12, %v2269_v0  ;;  %v567_v27 = vsel %vm559_vm4, %v2269_v0, %v2270_v35  ;;  %v1611_v12 = vperm.slane %v2997_v24, 3 }
 0x188   : > { %1499 = vmatpush.msra.mxu1 %v757_v52  ;;  %1543 = vmatpush.msra.mxu0 %v857_v4 }
 0x189   : > { %v3219_v55 = vpop.permute.xlu0 %1381 }
 0x18a   : > { %1500 = vmatpush.msra.mxu1 %v664_v9  ;;  %1544 = vmatpush.msra.mxu0 %v762_v10 }
 0x18b   : > { %2046 = vmatmul.msk.f32.gmra.mxu3 %vm1389_vm7, %v3012_v63  ;;  %1618 = vrot.lane.b32.xlu2 %v1611_v12, %s2343_s22 }
 0x18c   : > { %1501 = vmatpush.msra.mxu1 %v660_v51  ;;  %1545 = vmatpush.msra.mxu0 %v758_v43 }
 0x18d   : > { %2048 = vmatmul.msk.f32.gmra.mxu2 %vm1389_vm7, %v3012_v63  ;;  %v563_v63 = vsel %vm559_vm4, %v2274_v56, %v2275_v18 }
 0x18e   : > { %1502 = vmatpush.msra.mxu1 %v566_v5  ;;  %1546 = vmatpush.msra.mxu0 %v665_v37 }
 0x190   : > { %1503 = vmatpush.msra.mxu1 %v562_v29  ;;  %1547 = vmatpush.msra.mxu0 %v661_v39 }
 0x191   : > { %1504 = vmatmul.f32.vlgmr.msra.gmra.mxu1 %v3087_v40 }
 0x192   : > { %1548 = vmatpush.msra.mxu0 %v567_v27 }
 0x194   : > { %1549 = vmatpush.msra.mxu0 %v563_v63 }
 0x195   : > { %1550 = vmatmul.f32.vlgmr.msra.gmra.mxu0 %v3087_v40 }
 0x199   : > { %1507 = vmatmul.f32.gmra.mxu1 %v3128_v21 }
 0x19d   : > { %1553 = vmatmul.f32.gmra.mxu0 %v3128_v21 }
 0x1b8   : > { %v1747_v54 = vpop.permute.xlu1 %1746 }
 0x1cc   : > { %v3217_v59 = vpop.permute.xlu2 %1386 }
 0x1d2   : > { %v1615_v26 = vpop.permute.xlu1 %1614 }
 0x1d4   : > { %v1749_v45 = vpop.permute.xlu2 %1748  ;;  %v1613_v20 = vpop.permute.xlu0 %1612 }
 0x1d5   : > { %v1754_v3 = vsel %vm1669_vm8, %v1747_v54, %v1749_v45  ;;  %v1621_v14 = vsel %vm1620_vm9, %v1613_v20, %v1615_v26  ;;  %v1629_v22 = vmul.f32 0.0, %v1613_v20 }
 0x1da   : > { %v1617_v35 = vpop.permute.xlu1 %1616 }
 0x1db   : > { %v1622_v63 = vsel %vm1620_vm9, %v1615_v26, %v1617_v35 }
 0x1dd   : > { %v1751_v8 = vpop.permute.xlu2 %1750 }
 0x1de   : > { %v1755_v47 = vsel %vm1669_vm8, %v1749_v45, %v1751_v8 }
 0x1e3   : > { %v1482_v38 = vpop.f32.mrf.mxu3 }
 0x1e5   : > { %v1619_v5 = vpop.permute.xlu2 %1618 }
 0x1e8   : > { %v1753_v52 = vpop.permute.xlu0 %1752 }
 0x1e9   : > { %v1766_v10 = vmul.f32 0.0, %v1753_v52 }
 0x1eb   : > { %v1485_v46 = vpop.f32.mrf.mxu3 }
 0x1ed   : > { %v1436_v25 = vpop.f32.mrf.mxu1 }
 0x1f1   : > { %v1413_v36 = vpop.f32.mrf.mxu0 }
 0x1f2   : > { %v1414_v24 = vadd.f32 %v1413_v36, %v3219_v55 }
 0x1f4   : > { %v1437_v53 = vadd.f32 %v1436_v25, %v1414_v24  ;;  %v1623_v25 = vsel %vm1620_vm9, %v1617_v35, %v1619_v5 }
 0x1f5   : > { %v1439_v11 = vpop.f32.mrf.mxu1 }
 0x1f6   : > { %v3223_v23 = vmax.f32 %v1437_v53, 0.0 }
 0x1f8   : > { %v1459_v30 = vpop.f32.mrf.mxu2  ;;  %v1762_v32 = vmul.f32 %v1747_v54, %v3223_v23  ;;  %v1630_v19 = vmul.f32 %v1621_v14, %v3223_v23 }
 0x1f9   : > { %v1460_v40 = vadd.f32 %v1459_v30, %v3219_v55 }
 0x1fa   : > { %v1416_v62 = vpop.f32.mrf.mxu0  ;;  %v2292_v31 = vpack.i.bf16 %v1630_v19, %v1629_v22 }
 0x1fb   : > { %v1417_v21 = vadd.f32 %v1416_v62, %v3217_v59  ;;  %v1483_v48 = vadd.f32 %v1482_v38, %v1460_v40  ;;  %v1756_v40 = vsel %vm1669_vm8, %v1751_v8, %v1753_v52  ;;  %v3291_v52 = vld [vmem:[%s3341_s5] sm:$0xf] }
 0x1fd   : > { %v3227_v41 = vmax.f32 %v1483_v48, 0.0  ;;  %v1440_v33 = vadd.f32 %v1439_v11, %v1417_v21 }
 0x1ff   : > { %v3230_v58 = vmax.f32 %v1440_v33, 0.0  ;;  %v1763_v6 = vmul.f32 %v1754_v3, %v3227_v41 }
 0x200   : > { %v1462_v57 = vpop.f32.mrf.mxu2 }
 0x201   : > { %v1635_v60 = vmul.f32 %v1621_v14, %v3230_v58  ;;  %v1463_v44 = vadd.f32 %v1462_v57, %v3217_v59  ;;  %v2282_v15 = vpack.i.bf16 %v1763_v6, %v1762_v32  ;;  %v1767_v17 = vmul.f32 %v1747_v54, %v3230_v58 }
 0x203   : > { %v1486_v1 = vadd.f32 %v1485_v46, %v1463_v44  ;;  %2283 = vrot.lane.b32.xlu1 %v2282_v15, %s2343_s22  ;;  %v2277_v42 = vpack.i.bf16 %v1635_v60, %v1629_v22  ;;  %v3280_v15 = vld [vmem:[%s3344_s8 + $0x1] ss:$4 sm:$0xf] }
 0x204   : > { %v1706_v35 = vperm.slane %v3280_v15, 1 }
 0x205   : > { %v3238_v49 = vmax.f32 %v1486_v1, 0.0  ;;  %2278 = vrot.lane.b32.xlu2 %v2277_v42, %s2342_s16  ;;  %v1705_v42 = vperm.slane %v3280_v15, 0 }
 0x206   : > { %v1528_v28 = vpop.f32.mrf.mxu3 }
 0x207   : > { %v1768_v16 = vmul.f32 %v1754_v3, %v3238_v49  ;;  %v1636_v36 = vmul.f32 %v1622_v63, %v3238_v49 }
 0x208   : > { %v1574_v4 = vpop.f32.mrf.mxu2 }
 0x209   : > { %v2297_v61 = vpack.i.bf16 %v1768_v16, %v1767_v17  ;;  %v1717_v16 = vmul.f32 %v1705_v42, %v3230_v58 }
 0x20b   : > { %2298 = vrot.lane.b32.xlu0 %v2297_v61, %s2343_s22 }
 0x20d   : > { %2293 = vrot.lane.b32.xlu2 %v2292_v31, %s2342_s16 }
 0x20e   : > { %v1505_v2 = vpop.f32.mrf.mxu1  ;;  %v1531_v56 = vpop.f32.mrf.mxu3 }
 0x20f   : > { %v1506_v13 = vadd.f32 %v1505_v2, %v3219_v55 }
 0x210   : > { %v1577_v29 = vpop.f32.mrf.mxu2 }
 0x211   : > { %v1529_v50 = vadd.f32 %v1528_v28, %v1506_v13  ;;  %v1713_v28 = vmul.f32 %v1705_v42, %v3223_v23  ;;  %v1851_v23 = vld [vmem:[%s3342_s6] sm:$0xf] }
 0x212   : > { %v1551_v0 = vpop.f32.mrf.mxu0 }
 0x213   : > { %v3247_v9 = vmax.f32 %v1529_v50, 0.0  ;;  %v1552_v39 = vadd.f32 %v1551_v0, %v3219_v55  ;;  %v1631_v55 = vmul.f32 %v1622_v63, %v3227_v41 }
 0x215   : > { %v1764_v34 = vmul.f32 %v1755_v47, %v3247_v9  ;;  %v1575_v38 = vadd.f32 %v1574_v4, %v1552_v39  ;;  %v1632_v32 = vmul.f32 %v1623_v25, %v3247_v9 }
 0x216   : > { %v1508_v7 = vpop.f32.mrf.mxu1 }
 0x217   : > { %v2287_v51 = vpack.i.bf16 %v1764_v34, %v1766_v10  ;;  %v1509_v43 = vadd.f32 %v1508_v7, %v3217_v59  ;;  %v3268_v11 = vmax.f32 %v1575_v38, 0.0 }
 0x219   : > { %v1532_v37 = vadd.f32 %v1531_v56, %v1509_v43  ;;  %2288 = vrot.lane.b32.xlu1 %v2287_v51, %s2343_s22  ;;  %v1765_v3 = vmul.f32 %v1756_v40, %v3268_v11  ;;  %v1633_v33 = vmul.f32 %v1619_v5, %v3268_v11 }
 0x21a   : > { %v1554_v18 = vpop.f32.mrf.mxu0 }
 0x21b   : > { %v3253_v27 = vmax.f32 %v1532_v37, 0.0  ;;  %v1555_v12 = vadd.f32 %v1554_v18, %v3217_v59  ;;  %v2307_v20 = vpack.i.bf16 %v1766_v10, %v1765_v3  ;;  %v2322_v26 = vpack.i.bf16 %v1633_v33, %v1632_v32 }
 0x21c   : > { %v1718_v18 = vmul.f32 %v1706_v35, %v3238_v49 }
 0x21d   : > { %v1637_v24 = vmul.f32 %v1623_v25, %v3253_v27  ;;  %v1578_v54 = vadd.f32 %v1577_v29, %v1555_v12  ;;  %v1769_v45 = vmul.f32 %v1755_v47, %v3253_v27  ;;  %v1714_v12 = vmul.f32 %v1706_v35, %v3227_v41 }
 0x21f   : > { %v3260_v53 = vmax.f32 %v1578_v54, 0.0  ;;  %v2312_v30 = vpack.i.bf16 %v1637_v24, %v1636_v36  ;;  %v1707_v24 = vperm.slane %v3280_v15, 2 }
 0x221   : > { %v1638_v59 = vmul.f32 %v1619_v5, %v3260_v53  ;;  %v1770_v62 = vmul.f32 %v1756_v40, %v3260_v53  ;;  %2313 = vrot.lane.b32.xlu1 %v2312_v30, %s2342_s16  ;;  %v1708_v40 = vperm.slane %v3280_v15, 3  ;;  %v1719_v49 = vmul.f32 %v1707_v24, %v3253_v27 }
 0x223   : > { %v2302_v21 = vpack.i.bf16 %v1770_v62, %v1769_v45  ;;  %v2317_v48 = vpack.i.bf16 %v1631_v55, %v1638_v59  ;;  %v1720_v45 = vmul.f32 %v1708_v40, %v3260_v53  ;;  %v1715_v59 = vmul.f32 %v1707_v24, %v3247_v9 }
 0x224   : > { %v1716_v62 = vmul.f32 %v1708_v40, %v3268_v11 }
 0x225   : > { %2303 = vrot.lane.b32.xlu0 %v2302_v21, %s2343_s22  ;;  %2318 = vrot.lane.b32.xlu2 %v2317_v48, %s2342_s16 }
 0x229   : > { %1854 = vperm.xlu1 %2327, %v1851_v23  }
 0x22d   : > { %2308 = vrot.lane.b32.xlu0 %v2307_v20, %s2343_s22 }
 0x235   : > { %2323 = vrot.lane.b32.xlu0 %v2322_v26, %s2342_s16 }
 0x25f   : > { %v2279_v6 = vpop.permute.xlu2 %2278 }
 0x260   : > { %v2281_v61 = vunpack.i.h.bf16 %v2279_v6  ;;  %v2280_v31 = vunpack.i.l.bf16 %v2279_v6 }
 0x262   : > { %v1674_v13 = vsel %vm1669_vm8, %v2280_v31, %v2281_v61 }
 0x267   : > { %v2294_v19 = vpop.permute.xlu2 %2293 }
 0x268   : > { %v2296_v2 = vunpack.i.h.bf16 %v2294_v19  ;;  %v2295_v8 = vunpack.i.l.bf16 %v2294_v19 }
 0x26a   : > { %v1670_v4 = vsel %vm1669_vm8, %v2295_v8, %v2296_v2 }
 0x275   : > { %v2284_v14 = vpop.permute.xlu1 %2283 }
 0x276   : > { %v2286_v46 = vunpack.i.h.bf16 %v2284_v14  ;;  %v2285_v22 = vunpack.i.l.bf16 %v2284_v14 }
 0x278   : > { %v1802_v17 = vsel %vm1620_vm9, %v2285_v22, %v2286_v46 }
 0x27d   : > { %v2299_v57 = vpop.permute.xlu0 %2298 }
 0x27e   : > { %v2301_v60 = vunpack.i.h.bf16 %v2299_v57  ;;  %v2300_v44 = vunpack.i.l.bf16 %v2299_v57 }
 0x27f   : > { %v2319_v37 = vpop.permute.xlu2 %2318 }
 0x280   : > { %v1806_v1 = vsel %vm1620_vm9, %v2300_v44, %v2301_v60  ;;  %v2321_v63 = vunpack.i.h.bf16 %v2319_v37  ;;  %v2320_v21 = vunpack.i.l.bf16 %v2319_v37 }
 0x281   : > { %1871 = vmatpush.msrb.mxu3 %v1806_v1 }
 0x282   : > { %v1671_v41 = vsel %vm1669_vm8, %v2296_v2, %v2321_v63 }
 0x283   : > { %1872 = vmatpush.msrb.mxu3 %v1802_v17 }
 0x285   : > { %1873 = vmatpush.msrb.mxu3 %v1717_v16 }
 0x287   : > { %1874 = vmatpush.msrb.mxu3 %v1713_v28 }
 0x289   : > { %1875 = vmatpush.msrb.mxu3 %v1674_v13 }
 0x28b   : > { %1876 = vmatpush.msrb.mxu3 %v1670_v4  ;;  %v2289_v58 = vpop.permute.xlu1 %2288 }
 0x28c   : > { %2051 = vmatmul.msk.f32.vlgmr.msrb.gmra.mxu3 %vm1857_vm10, %v3291_v52  ;;  %v2291_v47 = vunpack.i.h.bf16 %v2289_v58  ;;  %v2290_v0 = vunpack.i.l.bf16 %v2289_v58 }
 0x28e   : > { %v1803_v5 = vsel %vm1620_vm9, %v2286_v46, %v2291_v47 }
 0x293   : > { %v2314_v43 = vpop.permute.xlu1 %2313 }
 0x294   : > { %v2315_v29 = vunpack.i.l.bf16 %v2314_v43  ;;  %v2316_v55 = vunpack.i.h.bf16 %v2314_v43 }
 0x296   : > { %v1675_v54 = vsel %vm1669_vm8, %v2281_v61, %v2315_v29  ;;  %v1676_v20 = vsel %vm1669_vm8, %v2315_v29, %v2316_v55  ;;  %v1677_v53 = vsel %vm1669_vm8, %v2316_v55, %v2320_v21 }
 0x297   : > { %v2304_v50 = vpop.permute.xlu0 %2303 }
 0x298   : > { %v2306_v10 = vunpack.i.h.bf16 %v2304_v50  ;;  %v2305_v34 = vunpack.i.l.bf16 %v2304_v50 }
 0x29a   : > { %v1807_v7 = vsel %vm1620_vm9, %v2301_v60, %v2305_v34  ;;  %v1808_v56 = vsel %vm1620_vm9, %v2305_v34, %v2306_v10  ;;  %v1809_v51 = vsel %vm1620_vm9, %v2306_v10, %v2290_v0 }
 0x29b   : > { %1891 = vmatpush.msra.mxu3 %v1807_v7  ;;  %1911 = vmatpush.msrb.mxu1 %v1808_v56  ;;  %v1855_v32 = vpop.permute.xlu1 %1854 }
 0x29c   : > { %1931 = vmatpush.msrb.mxu2 %v1809_v51 }
 0x29d   : > { %1892 = vmatpush.msra.mxu3 %v1803_v5 }
 0x29f   : > { %v2309_v39 = vpop.permute.xlu0 %2308  ;;  %1893 = vmatpush.msra.mxu3 %v1718_v18 }
 0x2a0   : > { %v2311_v25 = vunpack.i.h.bf16 %v2309_v39  ;;  %v2310_v36 = vunpack.i.l.bf16 %v2309_v39 }
 0x2a1   : > { %1894 = vmatpush.msra.mxu3 %v1714_v12 }
 0x2a2   : > { %v1804_v38 = vsel %vm1620_vm9, %v2291_v47, %v2310_v36  ;;  %v1805_v30 = vsel %vm1620_vm9, %v2310_v36, %v2311_v25 }
 0x2a3   : > { %1895 = vmatpush.msra.mxu3 %v1675_v54  ;;  %1912 = vmatpush.msrb.mxu1 %v1804_v38 }
 0x2a4   : > { %1932 = vmatpush.msrb.mxu2 %v1805_v30 }
 0x2a5   : > { %1896 = vmatpush.msra.mxu3 %v1671_v41  ;;  %1913 = vmatpush.msrb.mxu1 %v1719_v49 }
 0x2a6   : > { %1933 = vmatpush.msrb.mxu2 %v1720_v45  ;;  %2052 = vmatmul.msk.f32.vlgmr.msra.gmra.mxu3 %vm1857_vm10, %v3291_v52 }
 0x2a7   : > { %v2324_v48 = vpop.permute.xlu0 %2323  ;;  %1914 = vmatpush.msrb.mxu1 %v1715_v59 }
 0x2a8   : > { %v2326_v27 = vunpack.i.h.bf16 %v2324_v48  ;;  %v2325_v3 = vunpack.i.l.bf16 %v2324_v48  ;;  %1934 = vmatpush.msrb.mxu2 %v1716_v62 }
 0x2a9   : > { %1915 = vmatpush.msrb.mxu1 %v1676_v20 }
 0x2aa   : > { %1935 = vmatpush.msrb.mxu2 %v1677_v53  ;;  %v1672_v9 = vsel %vm1669_vm8, %v2321_v63, %v2325_v3  ;;  %v1673_v33 = vsel %vm1669_vm8, %v2325_v3, %v2326_v27 }
 0x2ab   : > { %1916 = vmatpush.msrb.mxu1 %v1672_v9 }
 0x2ac   : > { %1936 = vmatpush.msrb.mxu2 %v1673_v33  ;;  %2053 = vmatmul.msk.f32.vlgmr.msrb.gmra.mxu1 %vm1857_vm10, %v3291_v52 }
 0x2ad   : > { %2054 = vmatmul.msk.f32.vlgmr.msrb.gmra.mxu2 %vm1857_vm10, %v3291_v52 }
 0x30f   : > { %v1878_v11 = vpop.f32.mrf.mxu3 }
 0x310   : > { %v1879_v6 = vadd.f32 %v1878_v11, %v1855_v32 }
 0x312   : > { %v1941_v46 = vmax.f32 %v1879_v6, 0.0 }
 0x329   : > { %v1898_v26 = vpop.f32.mrf.mxu3  ;;  %v1918_v60 = vpop.f32.mrf.mxu1 }
 0x32a   : > { %v1899_v14 = vadd.f32 %v1898_v26, %v1855_v32  ;;  %v1919_v42 = vadd.f32 %v1918_v60, %v1855_v32 }
 0x32c   : > { %v1942_v57 = vmax.f32 %v1899_v14, 0.0  ;;  %v1943_v16 = vmax.f32 %v1919_v42, 0.0 }
 0x32e   : > { %v1949_v22 = vrot.slane %v1942_v57, 4 }
 0x330   : > { %v1951_v44 = vsel %vm369_vm0, %v1941_v46, %v1949_v22  ;;  %v1938_v15 = vpop.f32.mrf.mxu2 }
 0x331   : > { %1955 = vst [vmem:[%s332_s19] sm:$0xff] %v1951_v44  ;;  %v1939_v1 = vadd.f32 %v1938_v15, %v1855_v32 }
 0x333   : > { %v1944_v17 = vmax.f32 %v1939_v1, 0.0 }
 0x335   : > { %v1950_v19 = vrot.slane %v1944_v17, 4 }
 0x337   : > { %v1952_v61 = vsel %vm369_vm0, %v1943_v16, %v1950_v19 }
 0x338   : > { %1956 = vst [vmem:[%s332_s19 + $0x8] sm:$0xff] %v1952_v61 }
 0x339 PF: > { %s19_s30 = sadd.s32 1, %s2334_s30  }
 0x33a   : > { %p16_p4 = scmp.ge.s32.totalorder %s19_s30, 4  }
 0x33c   :  { %18 = sbr.rel (!%p16_p4) target bundleno = 1 (0x1), region = 97 }

</bundles_post_ra>
